<compile_context>
chip_gen: v7x
topology: tpu7x:2x2x1
jax: 0.10.0
libtpu: 0.0.40
codegen_flags: <defaults>
</compile_context>

<pallas_src>
import jax
import jax.numpy as jnp
import numpy as np
from jax import lax
from jax.experimental import pallas as pl
from jax.experimental.pallas import tpu as pltpu

# ---------------------------------------------------------------------------
# Model dimensions (F maps to TPU lanes, BB*T to sublanes).
# ---------------------------------------------------------------------------
F_DIM = 32                     # model dim (ff_cfg.input_dim / conformer size)
FF_DIM = 4 * F_DIM             # feed-forward hidden dim (=128, one full lane row)
N_HEADS = 4
HEAD_DIM = F_DIM // N_HEADS
KERNEL_SIZE = 7                # depthwise conv kernel size (odd, 'same' padding)
PAD = (KERNEL_SIZE - 1) // 2
EPS = 1e-5                     # LayerNorm / BatchNorm eps (PyTorch default)
NEG_BIG = 1e30                 # additive key-padding bias magnitude

# Packed per-feature parameter table: one row (128 lanes) per small vector.
VEC_ROWS = 32                  # 30 rows used, padded to a multiple of 8 sublanes
VEC_COLS = FF_DIM              # 128 (largest packed vector = FF bias)

(R_FF1_LN_G, R_FF1_LN_B, R_FF1_B1, R_FF1_B2,
 R_CV_LN_G, R_CV_LN_B, R_CV_BP1) = range(7)
R_CV_DW = 7                                        # rows 7..13: depthwise conv taps
R_CV_DW_B = R_CV_DW + KERNEL_SIZE                  # 14
(R_CV_BN_G, R_CV_BN_B, R_CV_BN_M, R_CV_BN_V, R_CV_BP2,
 R_SA_LN_G, R_SA_LN_B, R_SA_BQKV, R_SA_BO,
 R_FF2_LN_G, R_FF2_LN_B, R_FF2_B1, R_FF2_B2,
 R_FIN_LN_G, R_FIN_LN_B) = range(R_CV_DW_B + 1, R_CV_DW_B + 16)

_DW_OFF = 8   # sublane-aligned write offset inside the depthwise-conv scratch


# ---------------------------------------------------------------------------
# In-kernel helpers
# ---------------------------------------------------------------------------
def _layernorm(x, g, b):
    mean = jnp.mean(x, axis=-1, keepdims=True)
    var = jnp.mean((x - mean) ** 2, axis=-1, keepdims=True)
    return (x - mean) * lax.rsqrt(var + EPS) * g + b


def _sigmoid(x):
    # Exact sigmoid on the activation path (GLU / SiLU).  The only approximate
    # reciprocal left in the kernel is the softmax denominator.
    return 1.0 / (1.0 + jnp.exp(-x))


def _silu(x):
    return x * _sigmoid(x)


# ---------------------------------------------------------------------------
# Kernel: one grid step processes BB full sequences ([BB, T, F]).
# ---------------------------------------------------------------------------
def conformer_block_kernel(x_ref, bias_ref, vec_ref,
                           ff1_w1, ff1_w2, cv_wp1, cv_wp2,
                           sa_wqkv, sa_wo, ff2_w1, ff2_w2,
                           out_ref, cv_pad_ref):
    BB, T, F = x_ref.shape
    M = BB * T
    HB = N_HEADS * BB

    vecs = vec_ref[...]                                  # [VEC_ROWS, VEC_COLS]

    def vrow(r, n=F_DIM):                                # packed (1, n) parameter row
        return vecs[r:r + 1, :n]

    x = x_ref[...].astype(jnp.float32).reshape(M, F)     # flatten batch into matmul M
    key_bias = bias_ref[...]                             # [BB, 1, T]: 0 valid, -1e30 pad

    def ff_module(x2, r_ln, w1, r_b1, w2, r_b2):
        h = _layernorm(x2, vrow(r_ln), vrow(r_ln + 1))
        h = jnp.dot(h, w1[...], preferred_element_type=jnp.float32) + vrow(r_b1, FF_DIM)
        h = _silu(h)
        h = jnp.dot(h, w2[...], preferred_element_type=jnp.float32) + vrow(r_b2)
        return h                                         # dropout -> identity (eval)

    # ---------------- FF1 (half-step residual) ----------------
    x = 0.5 * ff_module(x, R_FF1_LN_G, ff1_w1, R_FF1_B1, ff1_w2, R_FF1_B2) + x

    # ---------------- Convolution module ----------------
    h = _layernorm(x, vrow(R_CV_LN_G), vrow(R_CV_LN_B))
    h = jnp.dot(h, cv_wp1[...], preferred_element_type=jnp.float32) + vrow(R_CV_BP1, 2 * F)
    h = h[:, :F] * _sigmoid(h[:, F:])                    # GLU over last dim

    # Depthwise conv along time ('same' zero padding, groups = F) on the flattened
    # [M, F] slab: write once into VMEM scratch (aligned offset), read K shifted
    # windows; the time-index mask provides the zero padding and stops any
    # cross-sequence bleed between adjacent sequences in the flat layout.
    @pl.when(pl.program_id(0) == 0)
    def _():
        # Zero the two halo rows only (the interior is rewritten every grid step).
        # Halo reads are masked by the time-index test below, so even stale halos on a
        # second TensorCore (which never runs program_id 0) cannot reach the output.
        cv_pad_ref[0:_DW_OFF, :] = jnp.zeros((_DW_OFF, F_DIM), jnp.float32)
        cv_pad_ref[_DW_OFF + M:_DW_OFF + M + _DW_OFF, :] = (
            jnp.zeros((_DW_OFF, F_DIM), jnp.float32))

    cv_pad_ref[_DW_OFF:_DW_OFF + M, :] = h               # aligned store (offset 8)
    # TODO(synk): a pltpu.roll(±1..3, sublane axis) variant would avoid the
    # store->reload round trip entirely; kept the scratch form for lowering safety.
    t_idx = lax.broadcasted_iota(jnp.int32, (M, 1), 0) % T   # time index within sequence
    acc = jnp.broadcast_to(vrow(R_CV_DW_B), (M, F))      # depthwise bias
    for k in range(KERNEL_SIZE):                         # static unroll, K small
        d = k - PAD
        tap = cv_pad_ref[_DW_OFF + d:_DW_OFF + d + M, :]
        valid = jnp.logical_and(t_idx + d >= 0, t_idx + d < T)
        acc = acc + jnp.where(valid, tap, 0.0) * vrow(R_CV_DW + k)
    # BatchNorm1d (eval mode: running statistics)
    h = (acc - vrow(R_CV_BN_M)) * lax.rsqrt(vrow(R_CV_BN_V) + EPS)
    h = h * vrow(R_CV_BN_G) + vrow(R_CV_BN_B)
    h = _silu(h)
    h = jnp.dot(h, cv_wp2[...], preferred_element_type=jnp.float32) + vrow(R_CV_BP2)
    x = h + x

    # ---------------- MHSA (all heads batched) ----------------
    h = _layernorm(x, vrow(R_SA_LN_G), vrow(R_SA_LN_B))
    qkv = jnp.dot(h, sa_wqkv[...], preferred_element_type=jnp.float32) + vrow(R_SA_BQKV, 3 * F)

    def split_heads(base):
        # [M, F] slab -> [N_HEADS * BB, T, HEAD_DIM] (head-major batch), so scores /
        # softmax / PV run once over every (head, sequence) pair.
        return jnp.stack(
            [qkv[:, base + hd * HEAD_DIM: base + (hd + 1) * HEAD_DIM].reshape(BB, T, HEAD_DIM)
             for hd in range(N_HEADS)], axis=0).reshape(HB, T, HEAD_DIM)

    qh = split_heads(0) * (1.0 / (HEAD_DIM ** 0.5))
    kh = split_heads(F)
    vh = split_heads(2 * F)

    s = jnp.einsum('bqd,bkd->bqk', qh, kh,
                   preferred_element_type=jnp.float32)               # [HB, T, T]
    s = (s.reshape(N_HEADS, BB, T, T) + key_bias[None]).reshape(HB, T, T)
    m = jnp.max(s, axis=-1, keepdims=True)
    e = jnp.exp(s - m)
    p = e * pl.reciprocal(jnp.sum(e, axis=-1, keepdims=True), approx=True)
    o = jnp.einsum('bqk,bkd->bqd', p, vh,
                   preferred_element_type=jnp.float32)               # [HB, T, HEAD_DIM]
    o = o.reshape(N_HEADS, M, HEAD_DIM)
    o_cat = jnp.concatenate([o[hd] for hd in range(N_HEADS)], axis=-1)   # [M, F]
    x = jnp.dot(o_cat, sa_wo[...], preferred_element_type=jnp.float32) + vrow(R_SA_BO) + x

    # ---------------- FF2 (half-step residual) ----------------
    x = 0.5 * ff_module(x, R_FF2_LN_G, ff2_w1, R_FF2_B1, ff2_w2, R_FF2_B2) + x

    # ---------------- Final layer norm ----------------
    x = _layernorm(x, vrow(R_FIN_LN_G), vrow(R_FIN_LN_B))
    out_ref[...] = x.reshape(BB, T, F).astype(out_ref.dtype)


# ---------------------------------------------------------------------------
# Wrapper: batch-block sizing, VMEM budgeting, pallas_call
# ---------------------------------------------------------------------------
_VMEM_WORKSET_BUDGET = 20 * 1024 * 1024   # conservative across v5e / v6e / v7x


def _step_vmem_bytes(bb, T):
    """Rough per-grid-step VMEM footprint (f32); score tensor dominates for large T."""
    m = bb * T
    scores = 2 * N_HEADS * bb * T * T * 4              # scores + exp copy, all heads
    acts = m * (3 * F_DIM + 2 * FF_DIM + 6 * F_DIM) * 4
    io = 2 * 2 * m * F_DIM * 4                         # double-buffered x / out blocks
    conv = (m + 2 * _DW_OFF) * F_DIM * 4
    weights = 4 * (2 * (F_DIM * FF_DIM + FF_DIM * F_DIM) + F_DIM * 2 * F_DIM
                   + F_DIM * F_DIM + F_DIM * 3 * F_DIM + F_DIM * F_DIM
                   + VEC_ROWS * VEC_COLS)
    return scores + acts + io + conv + weights


def _choose_batch_block(B, T, requested=None):
    if requested is not None:
        bb = max(1, min(requested, B))
    else:
        bb = max(1, min(B, max(1, 1024 // max(T, 1))))   # ~1024 matmul rows per step
    while bb > 1 and _step_vmem_bytes(bb, T) > _VMEM_WORKSET_BUDGET:
        bb = max(1, bb // 2)
    if B >= 2 and bb >= B:
        bb = (B + 1) // 2           # >= 2 grid steps so v7x can use both TensorCores
    return bb


def conformer_block(x, sequence_mask, kernel_params, *, batch_block=None):
    """x: [B, T, F] float32; sequence_mask: [B, T] (1 = valid frame)."""
    B, T, F = x.shape
    assert F == F_DIM
    vecs, mats = kernel_params

    BB = _choose_batch_block(B, T, batch_block)
    B_pad = ((B + BB - 1) // BB) * BB
    if B_pad != B:
        x = jnp.pad(x, ((0, B_pad - B), (0, 0), (0, 0)))
        sequence_mask = jnp.pad(sequence_mask, ((0, B_pad - B), (0, 0)))
    # Additive key-padding bias: 0 for valid keys, -1e30 for padded keys.  Computed once
    # here and simply added to the batched scores inside the kernel (no vselect).
    key_bias = ((sequence_mask.astype(jnp.float32) - 1.0) * NEG_BIG).reshape(B_pad, 1, T)
    n_grid = B_pad // BB
    M = BB * T

    in_specs = [
        pl.BlockSpec((BB, T, F), lambda g: (g, 0, 0)),   # x, blocked over batch
        pl.BlockSpec((BB, 1, T), lambda g: (g, 0, 0)),   # additive key mask bias
        pl.BlockSpec(vecs.shape, lambda g: (0, 0)),      # packed parameter-vector table
    ]
    for m in mats:                                       # matmul weights: whole array
        in_specs.append(pl.BlockSpec(m.shape, lambda g: (0, 0)))
    out_spec = pl.BlockSpec((BB, T, F), lambda g: (g, 0, 0))

    # Advisory cost hint for the XLA scheduler.
    Mtot = B_pad * T
    matmul_flops = 2 * Mtot * (2 * (F_DIM * FF_DIM + FF_DIM * F_DIM)       # ff1 + ff2
                               + F_DIM * 2 * F_DIM + F_DIM * F_DIM        # conv pointwise
                               + F_DIM * 3 * F_DIM + F_DIM * F_DIM)       # qkv + out proj
    attn_flops = 2 * B_pad * N_HEADS * (2 * T * T * HEAD_DIM)
    conv_flops = 2 * Mtot * F_DIM * KERNEL_SIZE
    transcendentals = Mtot * (2 * FF_DIM + 4 * F_DIM) + B_pad * N_HEADS * T * T
    bytes_accessed = 4 * (2 * B_pad * T * F_DIM + B_pad * T
                          + int(vecs.size) + sum(int(m.size) for m in mats))

    # Raise the scoped-VMEM limit above the v5e default (16 MiB) / v6e-v7x default
    # (32 MiB) based on the actual footprint, but stay below v7x's 64 MiB physical VMEM.
    vmem_limit = int(min(max(2 * _step_vmem_bytes(BB, T), 32 * 1024 * 1024),
                         48 * 1024 * 1024))

    out = pl.pallas_call(
        conformer_block_kernel,
        out_shape=jax.ShapeDtypeStruct((B_pad, T, F), jnp.float32),
        grid_spec=pltpu.PrefetchScalarGridSpec(
            num_scalar_prefetch=0,
            grid=(n_grid,),
            in_specs=in_specs,
            out_specs=out_spec,
            scratch_shapes=[pltpu.VMEM((M + 2 * _DW_OFF, F_DIM), jnp.float32)],
        ),
        compiler_params=pltpu.CompilerParams(
            dimension_semantics=("parallel",),
            vmem_limit_bytes=vmem_limit),
        cost_estimate=pl.CostEstimate(
            flops=int(matmul_flops + attn_flops + conv_flops),
            transcendentals=int(transcendentals),
            bytes_accessed=int(bytes_accessed)),
    )(x, key_bias, vecs, *mats)
    return out[:B]


# ---------------------------------------------------------------------------
# Parameters (synthetic, deterministic), packing, and pure-JAX reference
# ---------------------------------------------------------------------------
def init_params(key):
    """Deterministic synthetic parameters; Linear weights stored transposed as
    [in, out], depthwise Conv1d weight as [K, F] (== torch weight[:, 0, :].T)."""
    F, FF, K = F_DIM, FF_DIM, KERNEL_SIZE
    keys = jax.random.split(key, 20)
    w = lambda k, shape, s=0.1: s * jax.random.normal(k, shape, jnp.float32)
    ones = lambda n: jnp.ones((n,), jnp.float32)
    zeros = lambda n: jnp.zeros((n,), jnp.float32)
    return dict(
        ff1_ln_g=ones(F), ff1_ln_b=zeros(F),
        ff1_w1=w(keys[0], (F, FF)), ff1_b1=w(keys[1], (FF,), 0.05),
        ff1_w2=w(keys[2], (FF, F)), ff1_b2=w(keys[3], (F,), 0.05),
        cv_ln_g=ones(F), cv_ln_b=zeros(F),
        cv_wp1=w(keys[4], (F, 2 * F)), cv_bp1=w(keys[5], (2 * F,), 0.05),
        cv_wdw=w(keys[6], (K, F)), cv_bdw=w(keys[7], (F,), 0.05),
        cv_bn_g=ones(F), cv_bn_b=zeros(F), cv_bn_m=zeros(F), cv_bn_v=ones(F),
        cv_wp2=w(keys[8], (F, F)), cv_bp2=w(keys[9], (F,), 0.05),
        sa_ln_g=ones(F), sa_ln_b=zeros(F),
        sa_wqkv=w(keys[10], (F, 3 * F)), sa_bqkv=w(keys[11], (3 * F,), 0.05),
        sa_wo=w(keys[12], (F, F)), sa_bo=w(keys[13], (F,), 0.05),
        ff2_ln_g=ones(F), ff2_ln_b=zeros(F),
        ff2_w1=w(keys[14], (F, FF)), ff2_b1=w(keys[15], (FF,), 0.05),
        ff2_w2=w(keys[16], (FF, F)), ff2_b2=w(keys[17], (F,), 0.05),
        fin_ln_g=ones(F), fin_ln_b=zeros(F),
    )


def pack_params(p):
    """Pack all per-feature vectors + depthwise taps into one [32, 128] table
    (single DMA / BlockSpec) and collect the 8 matmul weight matrices."""
    vecs = jnp.zeros((VEC_ROWS, VEC_COLS), jnp.float32)
    entries = [
        (R_FF1_LN_G, 'ff1_ln_g'), (R_FF1_LN_B, 'ff1_ln_b'),
        (R_FF1_B1, 'ff1_b1'), (R_FF1_B2, 'ff1_b2'),
        (R_CV_LN_G, 'cv_ln_g'), (R_CV_LN_B, 'cv_ln_b'),
        (R_CV_BP1, 'cv_bp1'), (R_CV_DW_B, 'cv_bdw'),
        (R_CV_BN_G, 'cv_bn_g'), (R_CV_BN_B, 'cv_bn_b'),
        (R_CV_BN_M, 'cv_bn_m'), (R_CV_BN_V, 'cv_bn_v'),
        (R_CV_BP2, 'cv_bp2'),
        (R_SA_LN_G, 'sa_ln_g'), (R_SA_LN_B, 'sa_ln_b'),
        (R_SA_BQKV, 'sa_bqkv'), (R_SA_BO, 'sa_bo'),
        (R_FF2_LN_G, 'ff2_ln_g'), (R_FF2_LN_B, 'ff2_ln_b'),
        (R_FF2_B1, 'ff2_b1'), (R_FF2_B2, 'ff2_b2'),
        (R_FIN_LN_G, 'fin_ln_g'), (R_FIN_LN_B, 'fin_ln_b'),
    ]
    for r, name in entries:
        v = p[name]
        vecs = vecs.at[r, :v.shape[0]].set(v)
    vecs = vecs.at[R_CV_DW:R_CV_DW + KERNEL_SIZE, :F_DIM].set(p['cv_wdw'])
    mats = (p['ff1_w1'], p['ff1_w2'], p['cv_wp1'], p['cv_wp2'],
            p['sa_wqkv'], p['sa_wo'], p['ff2_w1'], p['ff2_w2'])
    return vecs, mats


def conformer_block_ref(x, sequence_mask, p):
    """Pure-JAX reference (eval-mode semantics) for correctness checking."""
    F = F_DIM

    def ln(v, g, b):
        m = jnp.mean(v, axis=-1, keepdims=True)
        var = jnp.mean((v - m) ** 2, axis=-1, keepdims=True)
        return (v - m) / jnp.sqrt(var + EPS) * g + b

    def ff(v, pre):
        h = ln(v, p[pre + '_ln_g'], p[pre + '_ln_b'])
        h = h @ p[pre + '_w1'] + p[pre + '_b1']
        h = h * jax.nn.sigmoid(h)
        return h @ p[pre + '_w2'] + p[pre + '_b2']

    B, T, _ = x.shape
    x = 0.5 * ff(x, 'ff1') + x
    # conv module
    h = ln(x, p['cv_ln_g'], p['cv_ln_b'])
    h = h @ p['cv_wp1'] + p['cv_bp1']
    h = h[..., :F] * jax.nn.sigmoid(h[..., F:])
    hp = jnp.pad(h, ((0, 0), (PAD, PAD), (0, 0)))
    acc = jnp.zeros_like(h) + p['cv_bdw']
    for k in range(KERNEL_SIZE):
        acc = acc + hp[:, k:k + T, :] * p['cv_wdw'][k]
    h = (acc - p['cv_bn_m']) / jnp.sqrt(p['cv_bn_v'] + EPS) * p['cv_bn_g'] + p['cv_bn_b']
    h = h * jax.nn.sigmoid(h)
    h = h @ p['cv_wp2'] + p['cv_bp2']
    x = h + x
    # mhsa
    h = ln(x, p['sa_ln_g'], p['sa_ln_b'])
    qkv = h @ p['sa_wqkv'] + p['sa_bqkv']
    q, k_, v = qkv[..., :F], qkv[..., F:2 * F], qkv[..., 2 * F:]
    q = q.reshape(B, T, N_HEADS, HEAD_DIM) / jnp.sqrt(float(HEAD_DIM))
    k_ = k_.reshape(B, T, N_HEADS, HEAD_DIM)
    v = v.reshape(B, T, N_HEADS, HEAD_DIM)
    s = jnp.einsum('bqhd,bkhd->bhqk', q, k_)
    s = jnp.where(sequence_mask[:, None, None, :] > 0, s, -1e30)
    att = jax.nn.softmax(s, axis=-1)
    o = jnp.einsum('bhqk,bkhd->bqhd', att, v).reshape(B, T, F)
    x = o @ p['sa_wo'] + p['sa_bo'] + x
    x = 0.5 * ff(x, 'ff2') + x
    return ln(x, p['fin_ln_g'], p['fin_ln_b'])


if __name__ == "__main__":
    B, T = 2, 8
    key = jax.random.PRNGKey(0)
    kx, kp = jax.random.split(key)

    x = jax.random.normal(kx, (B, T, F_DIM), jnp.float32)
    # valid lengths: [8, 6] -> mask 1 inside the sequence, 0 in the padding
    lengths = jnp.array([8, 6], jnp.int32)
    t_idx = jnp.arange(T, dtype=jnp.int32)[None, :]
    sequence_mask = (t_idx < lengths[:, None]).astype(jnp.float32)   # [B, T]

    params = init_params(kp)
    kernel_params = pack_params(params)

    out = conformer_block(x, sequence_mask, kernel_params)
    out = jax.block_until_ready(out)

    assert out.shape == (B, T, F_DIM)
    assert bool(jnp.all(jnp.isfinite(out)))

    with jax.default_matmul_precision("highest"):
        ref = conformer_block_ref(x, sequence_mask, params)
    np.testing.assert_allclose(np.asarray(out), np.asarray(ref), rtol=2e-2, atol=2e-2)

    print("KERNEL_OK")
</pallas_src>

<mosaic_0001>
module attributes {stable_mosaic.version = 11 : i64} {
  func.func @conformer_block_kernel(%arg0: i32, %arg1: memref<1x8x32xf32, #tpu.memory_space<vmem>>, %arg2: memref<1x1x8xf32, #tpu.memory_space<vmem>>, %arg3: memref<32x128xf32, #tpu.memory_space<vmem>>, %arg4: memref<32x128xf32, #tpu.memory_space<vmem>>, %arg5: memref<128x32xf32, #tpu.memory_space<vmem>>, %arg6: memref<32x64xf32, #tpu.memory_space<vmem>>, %arg7: memref<32x32xf32, #tpu.memory_space<vmem>>, %arg8: memref<32x96xf32, #tpu.memory_space<vmem>>, %arg9: memref<32x32xf32, #tpu.memory_space<vmem>>, %arg10: memref<32x128xf32, #tpu.memory_space<vmem>>, %arg11: memref<128x32xf32, #tpu.memory_space<vmem>>, %arg12: memref<1x8x32xf32, #tpu.memory_space<vmem>>, %arg13: memref<24x32xf32, #tpu.memory_space<vmem>>) attributes {dimension_semantics = [#tpu.dimension_semantics<parallel>], iteration_bounds = array<i64: 2>, scalar_prefetch = 0 : i64, scratch_operands = 1 : i64, tpu.core_type = #tpu.core_type<tc>, window_params = [{transform_indices = @transform_0, window_bounds = array<i64: 1, 8, 32>}, {transform_indices = @transform_1, window_bounds = array<i64: 1, 1, 8>}, {pipeline_mode = #tpu.pipeline_mode<synchronous>, transform_indices = @transform_2, window_bounds = array<i64: 32, 128>}, {pipeline_mode = #tpu.pipeline_mode<synchronous>, transform_indices = @transform_3, window_bounds = array<i64: 32, 128>}, {pipeline_mode = #tpu.pipeline_mode<synchronous>, transform_indices = @transform_4, window_bounds = array<i64: 128, 32>}, {pipeline_mode = #tpu.pipeline_mode<synchronous>, transform_indices = @transform_5, window_bounds = array<i64: 32, 64>}, {pipeline_mode = #tpu.pipeline_mode<synchronous>, transform_indices = @transform_6, window_bounds = array<i64: 32, 32>}, {pipeline_mode = #tpu.pipeline_mode<synchronous>, transform_indices = @transform_7, window_bounds = array<i64: 32, 96>}, {pipeline_mode = #tpu.pipeline_mode<synchronous>, transform_indices = @transform_8, window_bounds = array<i64: 32, 32>}, {pipeline_mode = #tpu.pipeline_mode<synchronous>, transform_indices = @transform_9, window_bounds = array<i64: 32, 128>}, {pipeline_mode = #tpu.pipeline_mode<synchronous>, transform_indices = @transform_10, window_bounds = array<i64: 128, 32>}, {transform_indices = @transform_11, window_bounds = array<i64: 1, 8, 32>}]} {
    %c0 = arith.constant 0 : index
    %c0_0 = arith.constant 0 : index
    %0 = vector.load %arg3[%c0, %c0_0] : memref<32x128xf32, #tpu.memory_space<vmem>>, vector<32x128xf32>
    %c0_1 = arith.constant 0 : index
    %c0_2 = arith.constant 0 : index
    %c0_3 = arith.constant 0 : index
    %1 = vector.load %arg1[%c0_1, %c0_2, %c0_3] : memref<1x8x32xf32, #tpu.memory_space<vmem>>, vector<1x8x32xf32>
    %2 = vector.shape_cast %1 : vector<1x8x32xf32> to vector<8x32xf32>
    %c0_4 = arith.constant 0 : index
    %c0_5 = arith.constant 0 : index
    %c0_6 = arith.constant 0 : index
    %3 = vector.load %arg2[%c0_4, %c0_5, %c0_6] : memref<1x1x8xf32, #tpu.memory_space<vmem>>, vector<1x1x8xf32>
    %4 = vector.extract_strided_slice %0 {offsets = [0, 0], sizes = [1, 32], strides = [1, 1]} : vector<32x128xf32> to vector<1x32xf32>
    %5 = vector.extract_strided_slice %0 {offsets = [1, 0], sizes = [1, 32], strides = [1, 1]} : vector<32x128xf32> to vector<1x32xf32>
    %cst = arith.constant dense<0.000000e+00> : vector<8xf32>
    %6 = vector.multi_reduction <add>, %2, %cst [1] : vector<8x32xf32> to vector<8xf32>
    %7 = vector.shape_cast %6 : vector<8xf32> to vector<8x1xf32>
    %cst_7 = arith.constant 3.200000e+01 : f32
    %8 = vector.broadcast %cst_7 : f32 to vector<8x1xf32>
    %9 = arith.divf %7, %8 : vector<8x1xf32>
    %10 = vector.broadcast %9 : vector<8x1xf32> to vector<8x32xf32>
    %11 = arith.subf %2, %10 : vector<8x32xf32>
    %12 = arith.mulf %11, %11 : vector<8x32xf32>
    %cst_8 = arith.constant dense<0.000000e+00> : vector<8xf32>
    %13 = vector.multi_reduction <add>, %12, %cst_8 [1] : vector<8x32xf32> to vector<8xf32>
    %14 = vector.shape_cast %13 : vector<8xf32> to vector<8x1xf32>
    %cst_9 = arith.constant 3.200000e+01 : f32
    %15 = vector.broadcast %cst_9 : f32 to vector<8x1xf32>
    %16 = arith.divf %14, %15 : vector<8x1xf32>
    %17 = vector.broadcast %9 : vector<8x1xf32> to vector<8x32xf32>
    %18 = arith.subf %2, %17 : vector<8x32xf32>
    %cst_10 = arith.constant 9.99999974E-6 : f32
    %19 = vector.broadcast %cst_10 : f32 to vector<8x1xf32>
    %20 = arith.addf %16, %19 : vector<8x1xf32>
    %21 = math.rsqrt %20 : vector<8x1xf32>
    %22 = vector.broadcast %21 : vector<8x1xf32> to vector<8x32xf32>
    %23 = arith.mulf %18, %22 : vector<8x32xf32>
    %24 = vector.broadcast %4 : vector<1x32xf32> to vector<8x32xf32>
    %25 = arith.mulf %23, %24 : vector<8x32xf32>
    %26 = vector.broadcast %5 : vector<1x32xf32> to vector<8x32xf32>
    %27 = arith.addf %25, %26 : vector<8x32xf32>
    %c0_11 = arith.constant 0 : index
    %c0_12 = arith.constant 0 : index
    %28 = vector.load %arg4[%c0_11, %c0_12] : memref<32x128xf32, #tpu.memory_space<vmem>>, vector<32x128xf32>
    %cst_13 = arith.constant dense<0.000000e+00> : vector<8x128xf32>
    %29 = tpu.matmul %27, %28, %cst_13 {dimension_numbers = #tpu.dot_dimension_numbers<[1], [0], [0], [1], [0, 0, 1, 1], [], []>} : vector<8x32xf32>, vector<32x128xf32>, vector<8x128xf32> -> vector<8x128xf32>
    %30 = vector.extract_strided_slice %0 {offsets = [2, 0], sizes = [1, 128], strides = [1, 1]} : vector<32x128xf32> to vector<1x128xf32>
    %31 = vector.broadcast %30 : vector<1x128xf32> to vector<8x128xf32>
    %32 = arith.addf %29, %31 : vector<8x128xf32>
    %cst_14 = arith.constant 0.000000e+00 : f32
    %33 = vector.broadcast %cst_14 : f32 to vector<8x128xf32>
    %34 = arith.subf %33, %32 : vector<8x128xf32>
    %35 = math.exp %34 : vector<8x128xf32>
    %cst_15 = arith.constant 1.000000e+00 : f32
    %36 = vector.broadcast %cst_15 : f32 to vector<8x128xf32>
    %37 = arith.addf %36, %35 : vector<8x128xf32>
    %cst_16 = arith.constant 1.000000e+00 : f32
    %38 = vector.broadcast %cst_16 : f32 to vector<8x128xf32>
    %39 = arith.divf %38, %37 : vector<8x128xf32>
    %40 = arith.mulf %32, %39 : vector<8x128xf32>
    %c0_17 = arith.constant 0 : index
    %c0_18 = arith.constant 0 : index
    %41 = vector.load %arg5[%c0_17, %c0_18] : memref<128x32xf32, #tpu.memory_space<vmem>>, vector<128x32xf32>
    %cst_19 = arith.constant dense<0.000000e+00> : vector<8x32xf32>
    %42 = tpu.matmul %40, %41, %cst_19 {dimension_numbers = #tpu.dot_dimension_numbers<[1], [0], [0], [1], [0, 0, 1, 1], [], []>} : vector<8x128xf32>, vector<128x32xf32>, vector<8x32xf32> -> vector<8x32xf32>
    %43 = vector.extract_strided_slice %0 {offsets = [3, 0], sizes = [1, 32], strides = [1, 1]} : vector<32x128xf32> to vector<1x32xf32>
    %44 = vector.broadcast %43 : vector<1x32xf32> to vector<8x32xf32>
    %45 = arith.addf %42, %44 : vector<8x32xf32>
    %cst_20 = arith.constant 5.000000e-01 : f32
    %46 = vector.broadcast %cst_20 : f32 to vector<8x32xf32>
    %47 = arith.mulf %46, %45 : vector<8x32xf32>
    %48 = arith.addf %47, %2 : vector<8x32xf32>
    %49 = vector.extract_strided_slice %0 {offsets = [4, 0], sizes = [1, 32], strides = [1, 1]} : vector<32x128xf32> to vector<1x32xf32>
    %50 = vector.extract_strided_slice %0 {offsets = [5, 0], sizes = [1, 32], strides = [1, 1]} : vector<32x128xf32> to vector<1x32xf32>
    %cst_21 = arith.constant dense<0.000000e+00> : vector<8xf32>
    %51 = vector.multi_reduction <add>, %48, %cst_21 [1] : vector<8x32xf32> to vector<8xf32>
    %52 = vector.shape_cast %51 : vector<8xf32> to vector<8x1xf32>
    %cst_22 = arith.constant 3.200000e+01 : f32
    %53 = vector.broadcast %cst_22 : f32 to vector<8x1xf32>
    %54 = arith.divf %52, %53 : vector<8x1xf32>
    %55 = vector.broadcast %54 : vector<8x1xf32> to vector<8x32xf32>
    %56 = arith.subf %48, %55 : vector<8x32xf32>
    %57 = arith.mulf %56, %56 : vector<8x32xf32>
    %cst_23 = arith.constant dense<0.000000e+00> : vector<8xf32>
    %58 = vector.multi_reduction <add>, %57, %cst_23 [1] : vector<8x32xf32> to vector<8xf32>
    %59 = vector.shape_cast %58 : vector<8xf32> to vector<8x1xf32>
    %cst_24 = arith.constant 3.200000e+01 : f32
    %60 = vector.broadcast %cst_24 : f32 to vector<8x1xf32>
    %61 = arith.divf %59, %60 : vector<8x1xf32>
    %62 = vector.broadcast %54 : vector<8x1xf32> to vector<8x32xf32>
    %63 = arith.subf %48, %62 : vector<8x32xf32>
    %cst_25 = arith.constant 9.99999974E-6 : f32
    %64 = vector.broadcast %cst_25 : f32 to vector<8x1xf32>
    %65 = arith.addf %61, %64 : vector<8x1xf32>
    %66 = math.rsqrt %65 : vector<8x1xf32>
    %67 = vector.broadcast %66 : vector<8x1xf32> to vector<8x32xf32>
    %68 = arith.mulf %63, %67 : vector<8x32xf32>
    %69 = vector.broadcast %49 : vector<1x32xf32> to vector<8x32xf32>
    %70 = arith.mulf %68, %69 : vector<8x32xf32>
    %71 = vector.broadcast %50 : vector<1x32xf32> to vector<8x32xf32>
    %72 = arith.addf %70, %71 : vector<8x32xf32>
    %c0_26 = arith.constant 0 : index
    %c0_27 = arith.constant 0 : index
    %73 = vector.load %arg6[%c0_26, %c0_27] : memref<32x64xf32, #tpu.memory_space<vmem>>, vector<32x64xf32>
    %cst_28 = arith.constant dense<0.000000e+00> : vector<8x64xf32>
    %74 = tpu.matmul %72, %73, %cst_28 {dimension_numbers = #tpu.dot_dimension_numbers<[1], [0], [0], [1], [0, 0, 1, 1], [], []>} : vector<8x32xf32>, vector<32x64xf32>, vector<8x64xf32> -> vector<8x64xf32>
    %75 = vector.extract_strided_slice %0 {offsets = [6, 0], sizes = [1, 64], strides = [1, 1]} : vector<32x128xf32> to vector<1x64xf32>
    %76 = vector.broadcast %75 : vector<1x64xf32> to vector<8x64xf32>
    %77 = arith.addf %74, %76 : vector<8x64xf32>
    %78 = vector.extract_strided_slice %77 {offsets = [0, 0], sizes = [8, 32], strides = [1, 1]} : vector<8x64xf32> to vector<8x32xf32>
    %79 = vector.extract_strided_slice %77 {offsets = [0, 32], sizes = [8, 32], strides = [1, 1]} : vector<8x64xf32> to vector<8x32xf32>
    %cst_29 = arith.constant 0.000000e+00 : f32
    %80 = vector.broadcast %cst_29 : f32 to vector<8x32xf32>
    %81 = arith.subf %80, %79 : vector<8x32xf32>
    %82 = math.exp %81 : vector<8x32xf32>
    %cst_30 = arith.constant 1.000000e+00 : f32
    %83 = vector.broadcast %cst_30 : f32 to vector<8x32xf32>
    %84 = arith.addf %83, %82 : vector<8x32xf32>
    %cst_31 = arith.constant 1.000000e+00 : f32
    %85 = vector.broadcast %cst_31 : f32 to vector<8x32xf32>
    %86 = arith.divf %85, %84 : vector<8x32xf32>
    %87 = arith.mulf %78, %86 : vector<8x32xf32>
    %c0_i32 = arith.constant 0 : i32
    %88 = arith.cmpi eq, %arg0, %c0_i32 : i32
    %89 = arith.extui %88 : i1 to i32
    %c0_i32_32 = arith.constant 0 : i32
    %90 = arith.cmpi ne, %89, %c0_i32_32 : i32
    scf.if %90 {
      %cst_122 = arith.constant 0.000000e+00 : f32
      %443 = vector.broadcast %cst_122 : f32 to vector<8x32xf32>
      %c0_123 = arith.constant 0 : index
      %c0_124 = arith.constant 0 : index
      %444 = vector.load %arg13[%c0_123, %c0_124] : memref<24x32xf32, #tpu.memory_space<vmem>>, vector<8x32xf32>
      tpu.vector_store %arg13[%c0_123, %c0_124], %443 {strides = array<i32>} : memref<24x32xf32, #tpu.memory_space<vmem>>, vector<8x32xf32>,
      %cst_125 = arith.constant 0.000000e+00 : f32
      %445 = vector.broadcast %cst_125 : f32 to vector<8x32xf32>
      %c16 = arith.constant 16 : index
      %c0_126 = arith.constant 0 : index
      %446 = vector.load %arg13[%c16, %c0_126] : memref<24x32xf32, #tpu.memory_space<vmem>>, vector<8x32xf32>
      tpu.vector_store %arg13[%c16, %c0_126], %445 {strides = array<i32>} : memref<24x32xf32, #tpu.memory_space<vmem>>, vector<8x32xf32>,
    } else {
    }
    %c8 = arith.constant 8 : index
    %c0_33 = arith.constant 0 : index
    %91 = vector.load %arg13[%c8, %c0_33] : memref<24x32xf32, #tpu.memory_space<vmem>>, vector<8x32xf32>
    tpu.vector_store %arg13[%c8, %c0_33], %87 {strides = array<i32>} : memref<24x32xf32, #tpu.memory_space<vmem>>, vector<8x32xf32>,
    %92 = tpu.iota {dimensions = array<i32: 0>} : vector<8x1xi32>
    %c8_i32 = arith.constant 8 : i32
    %c0_i32_34 = arith.constant 0 : i32
    %93 = arith.cmpi eq, %c8_i32, %c0_i32_34 : i32
    %c1_i32 = arith.constant 1 : i32
    %94 = arith.select %93, %c1_i32, %c8_i32 : i32
    %95 = vector.broadcast %94 : i32 to vector<8x1xi32>
    %96 = arith.remsi %92, %95 : vector<8x1xi32>
    %c0_i32_35 = arith.constant 0 : i32
    %97 = vector.broadcast %c0_i32_35 : i32 to vector<8x1xi32>
    %98 = arith.cmpi ne, %96, %97 : vector<8x1xi32>
    %c0_i32_36 = arith.constant 0 : i32
    %99 = vector.broadcast %c0_i32_36 : i32 to vector<8x1xi32>
    %100 = arith.cmpi slt, %96, %99 : vector<8x1xi32>
    %c0_i32_37 = arith.constant 0 : i32
    %101 = arith.cmpi slt, %94, %c0_i32_37 : i32
    %102 = vector.broadcast %101 : i1 to vector<8x1xi1>
    %103 = vector.broadcast %102 : vector<8x1xi1> to vector<8x1xi1>
    %104 = arith.xori %100, %103 : vector<8x1xi1>
    %105 = arith.andi %104, %98 : vector<8x1xi1>
    %106 = vector.broadcast %94 : i32 to vector<8x1xi32>
    %107 = arith.addi %96, %106 : vector<8x1xi32>
    %108 = arith.select %105, %107, %96 : vector<8x1xi1>, vector<8x1xi32>
    %109 = vector.extract_strided_slice %0 {offsets = [14, 0], sizes = [1, 32], strides = [1, 1]} : vector<32x128xf32> to vector<1x32xf32>
    %110 = vector.shape_cast %109 : vector<1x32xf32> to vector<1x32xf32>
    %111 = vector.broadcast %110 : vector<1x32xf32> to vector<8x32xf32>
    %c5 = arith.constant 5 : index
    %c0_38 = arith.constant 0 : index
    %112 = vector.load %arg13[%c5, %c0_38] : memref<24x32xf32, #tpu.memory_space<vmem>>, vector<8x32xf32>
    %c-3_i32 = arith.constant -3 : i32
    %113 = vector.broadcast %c-3_i32 : i32 to vector<8x1xi32>
    %114 = arith.addi %108, %113 : vector<8x1xi32>
    %c0_i32_39 = arith.constant 0 : i32
    %115 = vector.broadcast %c0_i32_39 : i32 to vector<8x1xi32>
    %116 = arith.cmpi sge, %114, %115 : vector<8x1xi32>
    %c-3_i32_40 = arith.constant -3 : i32
    %117 = vector.broadcast %c-3_i32_40 : i32 to vector<8x1xi32>
    %118 = arith.addi %108, %117 : vector<8x1xi32>
    %c8_i32_41 = arith.constant 8 : i32
    %119 = vector.broadcast %c8_i32_41 : i32 to vector<8x1xi32>
    %120 = arith.cmpi slt, %118, %119 : vector<8x1xi32>
    %121 = arith.andi %116, %120 : vector<8x1xi1>
    %cst_42 = arith.constant 0.000000e+00 : f32
    %122 = vector.shape_cast %121 : vector<8x1xi1> to vector<8x1xi1>
    %123 = vector.broadcast %122 : vector<8x1xi1> to vector<8x32xi1>
    %124 = vector.broadcast %cst_42 : f32 to vector<8x32xf32>
    %125 = arith.select %123, %112, %124 : vector<8x32xi1>, vector<8x32xf32>
    %126 = vector.extract_strided_slice %0 {offsets = [7, 0], sizes = [1, 32], strides = [1, 1]} : vector<32x128xf32> to vector<1x32xf32>
    %127 = vector.broadcast %126 : vector<1x32xf32> to vector<8x32xf32>
    %128 = arith.mulf %125, %127 : vector<8x32xf32>
    %129 = arith.addf %111, %128 : vector<8x32xf32>
    %c6 = arith.constant 6 : index
    %c0_43 = arith.constant 0 : index
    %130 = vector.load %arg13[%c6, %c0_43] : memref<24x32xf32, #tpu.memory_space<vmem>>, vector<8x32xf32>
    %c-2_i32 = arith.constant -2 : i32
    %131 = vector.broadcast %c-2_i32 : i32 to vector<8x1xi32>
    %132 = arith.addi %108, %131 : vector<8x1xi32>
    %c0_i32_44 = arith.constant 0 : i32
    %133 = vector.broadcast %c0_i32_44 : i32 to vector<8x1xi32>
    %134 = arith.cmpi sge, %132, %133 : vector<8x1xi32>
    %c-2_i32_45 = arith.constant -2 : i32
    %135 = vector.broadcast %c-2_i32_45 : i32 to vector<8x1xi32>
    %136 = arith.addi %108, %135 : vector<8x1xi32>
    %c8_i32_46 = arith.constant 8 : i32
    %137 = vector.broadcast %c8_i32_46 : i32 to vector<8x1xi32>
    %138 = arith.cmpi slt, %136, %137 : vector<8x1xi32>
    %139 = arith.andi %134, %138 : vector<8x1xi1>
    %cst_47 = arith.constant 0.000000e+00 : f32
    %140 = vector.shape_cast %139 : vector<8x1xi1> to vector<8x1xi1>
    %141 = vector.broadcast %140 : vector<8x1xi1> to vector<8x32xi1>
    %142 = vector.broadcast %cst_47 : f32 to vector<8x32xf32>
    %143 = arith.select %141, %130, %142 : vector<8x32xi1>, vector<8x32xf32>
    %144 = vector.extract_strided_slice %0 {offsets = [8, 0], sizes = [1, 32], strides = [1, 1]} : vector<32x128xf32> to vector<1x32xf32>
    %145 = vector.broadcast %144 : vector<1x32xf32> to vector<8x32xf32>
    %146 = arith.mulf %143, %145 : vector<8x32xf32>
    %147 = arith.addf %129, %146 : vector<8x32xf32>
    %c7 = arith.constant 7 : index
    %c0_48 = arith.constant 0 : index
    %148 = vector.load %arg13[%c7, %c0_48] : memref<24x32xf32, #tpu.memory_space<vmem>>, vector<8x32xf32>
    %c-1_i32 = arith.constant -1 : i32
    %149 = vector.broadcast %c-1_i32 : i32 to vector<8x1xi32>
    %150 = arith.addi %108, %149 : vector<8x1xi32>
    %c0_i32_49 = arith.constant 0 : i32
    %151 = vector.broadcast %c0_i32_49 : i32 to vector<8x1xi32>
    %152 = arith.cmpi sge, %150, %151 : vector<8x1xi32>
    %c-1_i32_50 = arith.constant -1 : i32
    %153 = vector.broadcast %c-1_i32_50 : i32 to vector<8x1xi32>
    %154 = arith.addi %108, %153 : vector<8x1xi32>
    %c8_i32_51 = arith.constant 8 : i32
    %155 = vector.broadcast %c8_i32_51 : i32 to vector<8x1xi32>
    %156 = arith.cmpi slt, %154, %155 : vector<8x1xi32>
    %157 = arith.andi %152, %156 : vector<8x1xi1>
    %cst_52 = arith.constant 0.000000e+00 : f32
    %158 = vector.shape_cast %157 : vector<8x1xi1> to vector<8x1xi1>
    %159 = vector.broadcast %158 : vector<8x1xi1> to vector<8x32xi1>
    %160 = vector.broadcast %cst_52 : f32 to vector<8x32xf32>
    %161 = arith.select %159, %148, %160 : vector<8x32xi1>, vector<8x32xf32>
    %162 = vector.extract_strided_slice %0 {offsets = [9, 0], sizes = [1, 32], strides = [1, 1]} : vector<32x128xf32> to vector<1x32xf32>
    %163 = vector.broadcast %162 : vector<1x32xf32> to vector<8x32xf32>
    %164 = arith.mulf %161, %163 : vector<8x32xf32>
    %165 = arith.addf %147, %164 : vector<8x32xf32>
    %c8_53 = arith.constant 8 : index
    %c0_54 = arith.constant 0 : index
    %166 = vector.load %arg13[%c8_53, %c0_54] : memref<24x32xf32, #tpu.memory_space<vmem>>, vector<8x32xf32>
    %c0_i32_55 = arith.constant 0 : i32
    %167 = vector.broadcast %c0_i32_55 : i32 to vector<8x1xi32>
    %168 = arith.addi %108, %167 : vector<8x1xi32>
    %c0_i32_56 = arith.constant 0 : i32
    %169 = vector.broadcast %c0_i32_56 : i32 to vector<8x1xi32>
    %170 = arith.cmpi sge, %168, %169 : vector<8x1xi32>
    %c0_i32_57 = arith.constant 0 : i32
    %171 = vector.broadcast %c0_i32_57 : i32 to vector<8x1xi32>
    %172 = arith.addi %108, %171 : vector<8x1xi32>
    %c8_i32_58 = arith.constant 8 : i32
    %173 = vector.broadcast %c8_i32_58 : i32 to vector<8x1xi32>
    %174 = arith.cmpi slt, %172, %173 : vector<8x1xi32>
    %175 = arith.andi %170, %174 : vector<8x1xi1>
    %cst_59 = arith.constant 0.000000e+00 : f32
    %176 = vector.shape_cast %175 : vector<8x1xi1> to vector<8x1xi1>
    %177 = vector.broadcast %176 : vector<8x1xi1> to vector<8x32xi1>
    %178 = vector.broadcast %cst_59 : f32 to vector<8x32xf32>
    %179 = arith.select %177, %166, %178 : vector<8x32xi1>, vector<8x32xf32>
    %180 = vector.extract_strided_slice %0 {offsets = [10, 0], sizes = [1, 32], strides = [1, 1]} : vector<32x128xf32> to vector<1x32xf32>
    %181 = vector.broadcast %180 : vector<1x32xf32> to vector<8x32xf32>
    %182 = arith.mulf %179, %181 : vector<8x32xf32>
    %183 = arith.addf %165, %182 : vector<8x32xf32>
    %c9 = arith.constant 9 : index
    %c0_60 = arith.constant 0 : index
    %184 = vector.load %arg13[%c9, %c0_60] : memref<24x32xf32, #tpu.memory_space<vmem>>, vector<8x32xf32>
    %c1_i32_61 = arith.constant 1 : i32
    %185 = vector.broadcast %c1_i32_61 : i32 to vector<8x1xi32>
    %186 = arith.addi %108, %185 : vector<8x1xi32>
    %c0_i32_62 = arith.constant 0 : i32
    %187 = vector.broadcast %c0_i32_62 : i32 to vector<8x1xi32>
    %188 = arith.cmpi sge, %186, %187 : vector<8x1xi32>
    %c1_i32_63 = arith.constant 1 : i32
    %189 = vector.broadcast %c1_i32_63 : i32 to vector<8x1xi32>
    %190 = arith.addi %108, %189 : vector<8x1xi32>
    %c8_i32_64 = arith.constant 8 : i32
    %191 = vector.broadcast %c8_i32_64 : i32 to vector<8x1xi32>
    %192 = arith.cmpi slt, %190, %191 : vector<8x1xi32>
    %193 = arith.andi %188, %192 : vector<8x1xi1>
    %cst_65 = arith.constant 0.000000e+00 : f32
    %194 = vector.shape_cast %193 : vector<8x1xi1> to vector<8x1xi1>
    %195 = vector.broadcast %194 : vector<8x1xi1> to vector<8x32xi1>
    %196 = vector.broadcast %cst_65 : f32 to vector<8x32xf32>
    %197 = arith.select %195, %184, %196 : vector<8x32xi1>, vector<8x32xf32>
    %198 = vector.extract_strided_slice %0 {offsets = [11, 0], sizes = [1, 32], strides = [1, 1]} : vector<32x128xf32> to vector<1x32xf32>
    %199 = vector.broadcast %198 : vector<1x32xf32> to vector<8x32xf32>
    %200 = arith.mulf %197, %199 : vector<8x32xf32>
    %201 = arith.addf %183, %200 : vector<8x32xf32>
    %c10 = arith.constant 10 : index
    %c0_66 = arith.constant 0 : index
    %202 = vector.load %arg13[%c10, %c0_66] : memref<24x32xf32, #tpu.memory_space<vmem>>, vector<8x32xf32>
    %c2_i32 = arith.constant 2 : i32
    %203 = vector.broadcast %c2_i32 : i32 to vector<8x1xi32>
    %204 = arith.addi %108, %203 : vector<8x1xi32>
    %c0_i32_67 = arith.constant 0 : i32
    %205 = vector.broadcast %c0_i32_67 : i32 to vector<8x1xi32>
    %206 = arith.cmpi sge, %204, %205 : vector<8x1xi32>
    %c2_i32_68 = arith.constant 2 : i32
    %207 = vector.broadcast %c2_i32_68 : i32 to vector<8x1xi32>
    %208 = arith.addi %108, %207 : vector<8x1xi32>
    %c8_i32_69 = arith.constant 8 : i32
    %209 = vector.broadcast %c8_i32_69 : i32 to vector<8x1xi32>
    %210 = arith.cmpi slt, %208, %209 : vector<8x1xi32>
    %211 = arith.andi %206, %210 : vector<8x1xi1>
    %cst_70 = arith.constant 0.000000e+00 : f32
    %212 = vector.shape_cast %211 : vector<8x1xi1> to vector<8x1xi1>
    %213 = vector.broadcast %212 : vector<8x1xi1> to vector<8x32xi1>
    %214 = vector.broadcast %cst_70 : f32 to vector<8x32xf32>
    %215 = arith.select %213, %202, %214 : vector<8x32xi1>, vector<8x32xf32>
    %216 = vector.extract_strided_slice %0 {offsets = [12, 0], sizes = [1, 32], strides = [1, 1]} : vector<32x128xf32> to vector<1x32xf32>
    %217 = vector.broadcast %216 : vector<1x32xf32> to vector<8x32xf32>
    %218 = arith.mulf %215, %217 : vector<8x32xf32>
    %219 = arith.addf %201, %218 : vector<8x32xf32>
    %c11 = arith.constant 11 : index
    %c0_71 = arith.constant 0 : index
    %220 = vector.load %arg13[%c11, %c0_71] : memref<24x32xf32, #tpu.memory_space<vmem>>, vector<8x32xf32>
    %c3_i32 = arith.constant 3 : i32
    %221 = vector.broadcast %c3_i32 : i32 to vector<8x1xi32>
    %222 = arith.addi %108, %221 : vector<8x1xi32>
    %c0_i32_72 = arith.constant 0 : i32
    %223 = vector.broadcast %c0_i32_72 : i32 to vector<8x1xi32>
    %224 = arith.cmpi sge, %222, %223 : vector<8x1xi32>
    %c3_i32_73 = arith.constant 3 : i32
    %225 = vector.broadcast %c3_i32_73 : i32 to vector<8x1xi32>
    %226 = arith.addi %108, %225 : vector<8x1xi32>
    %c8_i32_74 = arith.constant 8 : i32
    %227 = vector.broadcast %c8_i32_74 : i32 to vector<8x1xi32>
    %228 = arith.cmpi slt, %226, %227 : vector<8x1xi32>
    %229 = arith.andi %224, %228 : vector<8x1xi1>
    %cst_75 = arith.constant 0.000000e+00 : f32
    %230 = vector.shape_cast %229 : vector<8x1xi1> to vector<8x1xi1>
    %231 = vector.broadcast %230 : vector<8x1xi1> to vector<8x32xi1>
    %232 = vector.broadcast %cst_75 : f32 to vector<8x32xf32>
    %233 = arith.select %231, %220, %232 : vector<8x32xi1>, vector<8x32xf32>
    %234 = vector.extract_strided_slice %0 {offsets = [13, 0], sizes = [1, 32], strides = [1, 1]} : vector<32x128xf32> to vector<1x32xf32>
    %235 = vector.broadcast %234 : vector<1x32xf32> to vector<8x32xf32>
    %236 = arith.mulf %233, %235 : vector<8x32xf32>
    %237 = arith.addf %219, %236 : vector<8x32xf32>
    %238 = vector.extract_strided_slice %0 {offsets = [17, 0], sizes = [1, 32], strides = [1, 1]} : vector<32x128xf32> to vector<1x32xf32>
    %239 = vector.broadcast %238 : vector<1x32xf32> to vector<8x32xf32>
    %240 = arith.subf %237, %239 : vector<8x32xf32>
    %241 = vector.extract_strided_slice %0 {offsets = [18, 0], sizes = [1, 32], strides = [1, 1]} : vector<32x128xf32> to vector<1x32xf32>
    %cst_76 = arith.constant 9.99999974E-6 : f32
    %242 = vector.broadcast %cst_76 : f32 to vector<1x32xf32>
    %243 = arith.addf %241, %242 : vector<1x32xf32>
    %244 = math.rsqrt %243 : vector<1x32xf32>
    %245 = vector.broadcast %244 : vector<1x32xf32> to vector<8x32xf32>
    %246 = arith.mulf %240, %245 : vector<8x32xf32>
    %247 = vector.extract_strided_slice %0 {offsets = [15, 0], sizes = [1, 32], strides = [1, 1]} : vector<32x128xf32> to vector<1x32xf32>
    %248 = vector.broadcast %247 : vector<1x32xf32> to vector<8x32xf32>
    %249 = arith.mulf %246, %248 : vector<8x32xf32>
    %250 = vector.extract_strided_slice %0 {offsets = [16, 0], sizes = [1, 32], strides = [1, 1]} : vector<32x128xf32> to vector<1x32xf32>
    %251 = vector.broadcast %250 : vector<1x32xf32> to vector<8x32xf32>
    %252 = arith.addf %249, %251 : vector<8x32xf32>
    %cst_77 = arith.constant 0.000000e+00 : f32
    %253 = vector.broadcast %cst_77 : f32 to vector<8x32xf32>
    %254 = arith.subf %253, %252 : vector<8x32xf32>
    %255 = math.exp %254 : vector<8x32xf32>
    %cst_78 = arith.constant 1.000000e+00 : f32
    %256 = vector.broadcast %cst_78 : f32 to vector<8x32xf32>
    %257 = arith.addf %256, %255 : vector<8x32xf32>
    %cst_79 = arith.constant 1.000000e+00 : f32
    %258 = vector.broadcast %cst_79 : f32 to vector<8x32xf32>
    %259 = arith.divf %258, %257 : vector<8x32xf32>
    %260 = arith.mulf %252, %259 : vector<8x32xf32>
    %c0_80 = arith.constant 0 : index
    %c0_81 = arith.constant 0 : index
    %261 = vector.load %arg7[%c0_80, %c0_81] : memref<32x32xf32, #tpu.memory_space<vmem>>, vector<32x32xf32>
    %cst_82 = arith.constant dense<0.000000e+00> : vector<8x32xf32>
    %262 = tpu.matmul %260, %261, %cst_82 {dimension_numbers = #tpu.dot_dimension_numbers<[1], [0], [0], [1], [0, 0, 1, 1], [], []>} : vector<8x32xf32>, vector<32x32xf32>, vector<8x32xf32> -> vector<8x32xf32>
    %263 = vector.extract_strided_slice %0 {offsets = [19, 0], sizes = [1, 32], strides = [1, 1]} : vector<32x128xf32> to vector<1x32xf32>
    %264 = vector.broadcast %263 : vector<1x32xf32> to vector<8x32xf32>
    %265 = arith.addf %262, %264 : vector<8x32xf32>
    %266 = arith.addf %265, %48 : vector<8x32xf32>
    %267 = vector.extract_strided_slice %0 {offsets = [20, 0], sizes = [1, 32], strides = [1, 1]} : vector<32x128xf32> to vector<1x32xf32>
    %268 = vector.extract_strided_slice %0 {offsets = [21, 0], sizes = [1, 32], strides = [1, 1]} : vector<32x128xf32> to vector<1x32xf32>
    %cst_83 = arith.constant dense<0.000000e+00> : vector<8xf32>
    %269 = vector.multi_reduction <add>, %266, %cst_83 [1] : vector<8x32xf32> to vector<8xf32>
    %270 = vector.shape_cast %269 : vector<8xf32> to vector<8x1xf32>
    %cst_84 = arith.constant 3.200000e+01 : f32
    %271 = vector.broadcast %cst_84 : f32 to vector<8x1xf32>
    %272 = arith.divf %270, %271 : vector<8x1xf32>
    %273 = vector.broadcast %272 : vector<8x1xf32> to vector<8x32xf32>
    %274 = arith.subf %266, %273 : vector<8x32xf32>
    %275 = arith.mulf %274, %274 : vector<8x32xf32>
    %cst_85 = arith.constant dense<0.000000e+00> : vector<8xf32>
    %276 = vector.multi_reduction <add>, %275, %cst_85 [1] : vector<8x32xf32> to vector<8xf32>
    %277 = vector.shape_cast %276 : vector<8xf32> to vector<8x1xf32>
    %cst_86 = arith.constant 3.200000e+01 : f32
    %278 = vector.broadcast %cst_86 : f32 to vector<8x1xf32>
    %279 = arith.divf %277, %278 : vector<8x1xf32>
    %280 = vector.broadcast %272 : vector<8x1xf32> to vector<8x32xf32>
    %281 = arith.subf %266, %280 : vector<8x32xf32>
    %cst_87 = arith.constant 9.99999974E-6 : f32
    %282 = vector.broadcast %cst_87 : f32 to vector<8x1xf32>
    %283 = arith.addf %279, %282 : vector<8x1xf32>
    %284 = math.rsqrt %283 : vector<8x1xf32>
    %285 = vector.broadcast %284 : vector<8x1xf32> to vector<8x32xf32>
    %286 = arith.mulf %281, %285 : vector<8x32xf32>
    %287 = vector.broadcast %267 : vector<1x32xf32> to vector<8x32xf32>
    %288 = arith.mulf %286, %287 : vector<8x32xf32>
    %289 = vector.broadcast %268 : vector<1x32xf32> to vector<8x32xf32>
    %290 = arith.addf %288, %289 : vector<8x32xf32>
    %c0_88 = arith.constant 0 : index
    %c0_89 = arith.constant 0 : index
    %291 = vector.load %arg8[%c0_88, %c0_89] : memref<32x96xf32, #tpu.memory_space<vmem>>, vector<32x96xf32>
    %cst_90 = arith.constant dense<0.000000e+00> : vector<8x96xf32>
    %292 = tpu.matmul %290, %291, %cst_90 {dimension_numbers = #tpu.dot_dimension_numbers<[1], [0], [0], [1], [0, 0, 1, 1], [], []>} : vector<8x32xf32>, vector<32x96xf32>, vector<8x96xf32> -> vector<8x96xf32>
    %293 = vector.extract_strided_slice %0 {offsets = [22, 0], sizes = [1, 96], strides = [1, 1]} : vector<32x128xf32> to vector<1x96xf32>
    %294 = vector.broadcast %293 : vector<1x96xf32> to vector<8x96xf32>
    %295 = arith.addf %292, %294 : vector<8x96xf32>
    %296 = vector.extract_strided_slice %295 {offsets = [0, 0], sizes = [8, 8], strides = [1, 1]} : vector<8x96xf32> to vector<8x8xf32>
    %297 = vector.shape_cast %296 : vector<8x8xf32> to vector<1x8x8xf32>
    %298 = vector.extract_strided_slice %295 {offsets = [0, 8], sizes = [8, 8], strides = [1, 1]} : vector<8x96xf32> to vector<8x8xf32>
    %299 = vector.shape_cast %298 : vector<8x8xf32> to vector<1x8x8xf32>
    %300 = vector.extract_strided_slice %295 {offsets = [0, 16], sizes = [8, 8], strides = [1, 1]} : vector<8x96xf32> to vector<8x8xf32>
    %301 = vector.shape_cast %300 : vector<8x8xf32> to vector<1x8x8xf32>
    %302 = vector.extract_strided_slice %295 {offsets = [0, 24], sizes = [8, 8], strides = [1, 1]} : vector<8x96xf32> to vector<8x8xf32>
    %303 = vector.shape_cast %302 : vector<8x8xf32> to vector<1x8x8xf32>
    %304 = vector.shape_cast %297 : vector<1x8x8xf32> to vector<1x1x8x8xf32>
    %305 = vector.shape_cast %299 : vector<1x8x8xf32> to vector<1x1x8x8xf32>
    %306 = vector.shape_cast %301 : vector<1x8x8xf32> to vector<1x1x8x8xf32>
    %307 = vector.shape_cast %303 : vector<1x8x8xf32> to vector<1x1x8x8xf32>
    %308 = tpu.concatenate %304, %305, %306, %307 in 0 : vector<1x1x8x8xf32>, vector<1x1x8x8xf32>, vector<1x1x8x8xf32>, vector<1x1x8x8xf32> -> vector<4x1x8x8xf32>
    %309 = vector.shape_cast %308 : vector<4x1x8x8xf32> to vector<4x8x8xf32>
    %cst_91 = arith.constant 0.353553385 : f32
    %310 = vector.broadcast %cst_91 : f32 to vector<4x8x8xf32>
    %311 = arith.mulf %309, %310 : vector<4x8x8xf32>
    %312 = vector.extract_strided_slice %295 {offsets = [0, 32], sizes = [8, 8], strides = [1, 1]} : vector<8x96xf32> to vector<8x8xf32>
    %313 = vector.shape_cast %312 : vector<8x8xf32> to vector<1x8x8xf32>
    %314 = vector.extract_strided_slice %295 {offsets = [0, 40], sizes = [8, 8], strides = [1, 1]} : vector<8x96xf32> to vector<8x8xf32>
    %315 = vector.shape_cast %314 : vector<8x8xf32> to vector<1x8x8xf32>
    %316 = vector.extract_strided_slice %295 {offsets = [0, 48], sizes = [8, 8], strides = [1, 1]} : vector<8x96xf32> to vector<8x8xf32>
    %317 = vector.shape_cast %316 : vector<8x8xf32> to vector<1x8x8xf32>
    %318 = vector.extract_strided_slice %295 {offsets = [0, 56], sizes = [8, 8], strides = [1, 1]} : vector<8x96xf32> to vector<8x8xf32>
    %319 = vector.shape_cast %318 : vector<8x8xf32> to vector<1x8x8xf32>
    %320 = vector.shape_cast %313 : vector<1x8x8xf32> to vector<1x1x8x8xf32>
    %321 = vector.shape_cast %315 : vector<1x8x8xf32> to vector<1x1x8x8xf32>
    %322 = vector.shape_cast %317 : vector<1x8x8xf32> to vector<1x1x8x8xf32>
    %323 = vector.shape_cast %319 : vector<1x8x8xf32> to vector<1x1x8x8xf32>
    %324 = tpu.concatenate %320, %321, %322, %323 in 0 : vector<1x1x8x8xf32>, vector<1x1x8x8xf32>, vector<1x1x8x8xf32>, vector<1x1x8x8xf32> -> vector<4x1x8x8xf32>
    %325 = vector.shape_cast %324 : vector<4x1x8x8xf32> to vector<4x8x8xf32>
    %326 = vector.extract_strided_slice %295 {offsets = [0, 64], sizes = [8, 8], strides = [1, 1]} : vector<8x96xf32> to vector<8x8xf32>
    %327 = vector.shape_cast %326 : vector<8x8xf32> to vector<1x8x8xf32>
    %328 = vector.extract_strided_slice %295 {offsets = [0, 72], sizes = [8, 8], strides = [1, 1]} : vector<8x96xf32> to vector<8x8xf32>
    %329 = vector.shape_cast %328 : vector<8x8xf32> to vector<1x8x8xf32>
    %330 = vector.extract_strided_slice %295 {offsets = [0, 80], sizes = [8, 8], strides = [1, 1]} : vector<8x96xf32> to vector<8x8xf32>
    %331 = vector.shape_cast %330 : vector<8x8xf32> to vector<1x8x8xf32>
    %332 = vector.extract_strided_slice %295 {offsets = [0, 88], sizes = [8, 8], strides = [1, 1]} : vector<8x96xf32> to vector<8x8xf32>
    %333 = vector.shape_cast %332 : vector<8x8xf32> to vector<1x8x8xf32>
    %334 = vector.shape_cast %327 : vector<1x8x8xf32> to vector<1x1x8x8xf32>
    %335 = vector.shape_cast %329 : vector<1x8x8xf32> to vector<1x1x8x8xf32>
    %336 = vector.shape_cast %331 : vector<1x8x8xf32> to vector<1x1x8x8xf32>
    %337 = vector.shape_cast %333 : vector<1x8x8xf32> to vector<1x1x8x8xf32>
    %338 = tpu.concatenate %334, %335, %336, %337 in 0 : vector<1x1x8x8xf32>, vector<1x1x8x8xf32>, vector<1x1x8x8xf32>, vector<1x1x8x8xf32> -> vector<4x1x8x8xf32>
    %339 = vector.shape_cast %338 : vector<4x1x8x8xf32> to vector<4x8x8xf32>
    "tpu.trace_start"() <{level = 10 : i32, message = "bqd,bkd->bqk"}> : () -> ()
    %cst_92 = arith.constant dense<0.000000e+00> : vector<4x8x8xf32>
    %340 = tpu.matmul %311, %325, %cst_92 {dimension_numbers = #tpu.dot_dimension_numbers<[2], [2], [1], [1], [0, 0, 0, 1, 1, 1], [0], [0]>} : vector<4x8x8xf32>, vector<4x8x8xf32>, vector<4x8x8xf32> -> vector<4x8x8xf32>
    "tpu.trace_stop"() : () -> ()
    %341 = vector.shape_cast %340 : vector<4x8x8xf32> to vector<4x1x8x8xf32>
    %342 = vector.shape_cast %3 : vector<1x1x8xf32> to vector<1x1x1x8xf32>
    %343 = vector.broadcast %342 : vector<1x1x1x8xf32> to vector<4x1x8x8xf32>
    %344 = arith.addf %341, %343 : vector<4x1x8x8xf32>
    %345 = vector.shape_cast %344 : vector<4x1x8x8xf32> to vector<4x8x8xf32>
    %cst_93 = arith.constant dense<0xFF800000> : vector<4x8xf32>
    %346 = vector.multi_reduction <maximumf>, %345, %cst_93 [2] : vector<4x8x8xf32> to vector<4x8xf32>
    %347 = vector.shape_cast %346 : vector<4x8xf32> to vector<4x8x1xf32>
    %348 = vector.broadcast %347 : vector<4x8x1xf32> to vector<4x8x8xf32>
    %349 = arith.subf %345, %348 : vector<4x8x8xf32>
    %350 = math.exp %349 : vector<4x8x8xf32>
    %cst_94 = arith.constant dense<0.000000e+00> : vector<4x8xf32>
    %351 = vector.multi_reduction <add>, %350, %cst_94 [2] : vector<4x8x8xf32> to vector<4x8xf32>
    %352 = vector.shape_cast %351 : vector<4x8xf32> to vector<4x8x1xf32>
    %353 = tpu.reciprocal %352 {approx = true} : vector<4x8x1xf32> -> vector<4x8x1xf32>
    %354 = vector.broadcast %353 : vector<4x8x1xf32> to vector<4x8x8xf32>
    %355 = arith.mulf %350, %354 : vector<4x8x8xf32>
    "tpu.trace_start"() <{level = 10 : i32, message = "bqk,bkd->bqd"}> : () -> ()
    %cst_95 = arith.constant dense<0.000000e+00> : vector<4x8x8xf32>
    %356 = tpu.matmul %355, %339, %cst_95 {dimension_numbers = #tpu.dot_dimension_numbers<[2], [1], [1], [2], [0, 0, 0, 1, 1, 2], [0], [0]>} : vector<4x8x8xf32>, vector<4x8x8xf32>, vector<4x8x8xf32> -> vector<4x8x8xf32>
    "tpu.trace_stop"() : () -> ()
    %357 = vector.extract_strided_slice %356 {offsets = [0, 0, 0], sizes = [1, 8, 8], strides = [1, 1, 1]} : vector<4x8x8xf32> to vector<1x8x8xf32>
    %358 = vector.shape_cast %357 : vector<1x8x8xf32> to vector<8x8xf32>
    %359 = vector.extract_strided_slice %356 {offsets = [1, 0, 0], sizes = [1, 8, 8], strides = [1, 1, 1]} : vector<4x8x8xf32> to vector<1x8x8xf32>
    %360 = vector.shape_cast %359 : vector<1x8x8xf32> to vector<8x8xf32>
    %361 = vector.extract_strided_slice %356 {offsets = [2, 0, 0], sizes = [1, 8, 8], strides = [1, 1, 1]} : vector<4x8x8xf32> to vector<1x8x8xf32>
    %362 = vector.shape_cast %361 : vector<1x8x8xf32> to vector<8x8xf32>
    %363 = vector.extract_strided_slice %356 {offsets = [3, 0, 0], sizes = [1, 8, 8], strides = [1, 1, 1]} : vector<4x8x8xf32> to vector<1x8x8xf32>
    %364 = vector.shape_cast %363 : vector<1x8x8xf32> to vector<8x8xf32>
    %365 = tpu.concatenate %358, %360, %362, %364 in 1 : vector<8x8xf32>, vector<8x8xf32>, vector<8x8xf32>, vector<8x8xf32> -> vector<8x32xf32>
    %c0_96 = arith.constant 0 : index
    %c0_97 = arith.constant 0 : index
    %366 = vector.load %arg9[%c0_96, %c0_97] : memref<32x32xf32, #tpu.memory_space<vmem>>, vector<32x32xf32>
    %cst_98 = arith.constant dense<0.000000e+00> : vector<8x32xf32>
    %367 = tpu.matmul %365, %366, %cst_98 {dimension_numbers = #tpu.dot_dimension_numbers<[1], [0], [0], [1], [0, 0, 1, 1], [], []>} : vector<8x32xf32>, vector<32x32xf32>, vector<8x32xf32> -> vector<8x32xf32>
    %368 = vector.extract_strided_slice %0 {offsets = [23, 0], sizes = [1, 32], strides = [1, 1]} : vector<32x128xf32> to vector<1x32xf32>
    %369 = vector.broadcast %368 : vector<1x32xf32> to vector<8x32xf32>
    %370 = arith.addf %367, %369 : vector<8x32xf32>
    %371 = arith.addf %370, %266 : vector<8x32xf32>
    %372 = vector.extract_strided_slice %0 {offsets = [24, 0], sizes = [1, 32], strides = [1, 1]} : vector<32x128xf32> to vector<1x32xf32>
    %373 = vector.extract_strided_slice %0 {offsets = [25, 0], sizes = [1, 32], strides = [1, 1]} : vector<32x128xf32> to vector<1x32xf32>
    %cst_99 = arith.constant dense<0.000000e+00> : vector<8xf32>
    %374 = vector.multi_reduction <add>, %371, %cst_99 [1] : vector<8x32xf32> to vector<8xf32>
    %375 = vector.shape_cast %374 : vector<8xf32> to vector<8x1xf32>
    %cst_100 = arith.constant 3.200000e+01 : f32
    %376 = vector.broadcast %cst_100 : f32 to vector<8x1xf32>
    %377 = arith.divf %375, %376 : vector<8x1xf32>
    %378 = vector.broadcast %377 : vector<8x1xf32> to vector<8x32xf32>
    %379 = arith.subf %371, %378 : vector<8x32xf32>
    %380 = arith.mulf %379, %379 : vector<8x32xf32>
    %cst_101 = arith.constant dense<0.000000e+00> : vector<8xf32>
    %381 = vector.multi_reduction <add>, %380, %cst_101 [1] : vector<8x32xf32> to vector<8xf32>
    %382 = vector.shape_cast %381 : vector<8xf32> to vector<8x1xf32>
    %cst_102 = arith.constant 3.200000e+01 : f32
    %383 = vector.broadcast %cst_102 : f32 to vector<8x1xf32>
    %384 = arith.divf %382, %383 : vector<8x1xf32>
    %385 = vector.broadcast %377 : vector<8x1xf32> to vector<8x32xf32>
    %386 = arith.subf %371, %385 : vector<8x32xf32>
    %cst_103 = arith.constant 9.99999974E-6 : f32
    %387 = vector.broadcast %cst_103 : f32 to vector<8x1xf32>
    %388 = arith.addf %384, %387 : vector<8x1xf32>
    %389 = math.rsqrt %388 : vector<8x1xf32>
    %390 = vector.broadcast %389 : vector<8x1xf32> to vector<8x32xf32>
    %391 = arith.mulf %386, %390 : vector<8x32xf32>
    %392 = vector.broadcast %372 : vector<1x32xf32> to vector<8x32xf32>
    %393 = arith.mulf %391, %392 : vector<8x32xf32>
    %394 = vector.broadcast %373 : vector<1x32xf32> to vector<8x32xf32>
    %395 = arith.addf %393, %394 : vector<8x32xf32>
    %c0_104 = arith.constant 0 : index
    %c0_105 = arith.constant 0 : index
    %396 = vector.load %arg10[%c0_104, %c0_105] : memref<32x128xf32, #tpu.memory_space<vmem>>, vector<32x128xf32>
    %cst_106 = arith.constant dense<0.000000e+00> : vector<8x128xf32>
    %397 = tpu.matmul %395, %396, %cst_106 {dimension_numbers = #tpu.dot_dimension_numbers<[1], [0], [0], [1], [0, 0, 1, 1], [], []>} : vector<8x32xf32>, vector<32x128xf32>, vector<8x128xf32> -> vector<8x128xf32>
    %398 = vector.extract_strided_slice %0 {offsets = [26, 0], sizes = [1, 128], strides = [1, 1]} : vector<32x128xf32> to vector<1x128xf32>
    %399 = vector.broadcast %398 : vector<1x128xf32> to vector<8x128xf32>
    %400 = arith.addf %397, %399 : vector<8x128xf32>
    %cst_107 = arith.constant 0.000000e+00 : f32
    %401 = vector.broadcast %cst_107 : f32 to vector<8x128xf32>
    %402 = arith.subf %401, %400 : vector<8x128xf32>
    %403 = math.exp %402 : vector<8x128xf32>
    %cst_108 = arith.constant 1.000000e+00 : f32
    %404 = vector.broadcast %cst_108 : f32 to vector<8x128xf32>
    %405 = arith.addf %404, %403 : vector<8x128xf32>
    %cst_109 = arith.constant 1.000000e+00 : f32
    %406 = vector.broadcast %cst_109 : f32 to vector<8x128xf32>
    %407 = arith.divf %406, %405 : vector<8x128xf32>
    %408 = arith.mulf %400, %407 : vector<8x128xf32>
    %c0_110 = arith.constant 0 : index
    %c0_111 = arith.constant 0 : index
    %409 = vector.load %arg11[%c0_110, %c0_111] : memref<128x32xf32, #tpu.memory_space<vmem>>, vector<128x32xf32>
    %cst_112 = arith.constant dense<0.000000e+00> : vector<8x32xf32>
    %410 = tpu.matmul %408, %409, %cst_112 {dimension_numbers = #tpu.dot_dimension_numbers<[1], [0], [0], [1], [0, 0, 1, 1], [], []>} : vector<8x128xf32>, vector<128x32xf32>, vector<8x32xf32> -> vector<8x32xf32>
    %411 = vector.extract_strided_slice %0 {offsets = [27, 0], sizes = [1, 32], strides = [1, 1]} : vector<32x128xf32> to vector<1x32xf32>
    %412 = vector.broadcast %411 : vector<1x32xf32> to vector<8x32xf32>
    %413 = arith.addf %410, %412 : vector<8x32xf32>
    %cst_113 = arith.constant 5.000000e-01 : f32
    %414 = vector.broadcast %cst_113 : f32 to vector<8x32xf32>
    %415 = arith.mulf %414, %413 : vector<8x32xf32>
    %416 = arith.addf %415, %371 : vector<8x32xf32>
    %417 = vector.extract_strided_slice %0 {offsets = [28, 0], sizes = [1, 32], strides = [1, 1]} : vector<32x128xf32> to vector<1x32xf32>
    %418 = vector.extract_strided_slice %0 {offsets = [29, 0], sizes = [1, 32], strides = [1, 1]} : vector<32x128xf32> to vector<1x32xf32>
    %cst_114 = arith.constant dense<0.000000e+00> : vector<8xf32>
    %419 = vector.multi_reduction <add>, %416, %cst_114 [1] : vector<8x32xf32> to vector<8xf32>
    %420 = vector.shape_cast %419 : vector<8xf32> to vector<8x1xf32>
    %cst_115 = arith.constant 3.200000e+01 : f32
    %421 = vector.broadcast %cst_115 : f32 to vector<8x1xf32>
    %422 = arith.divf %420, %421 : vector<8x1xf32>
    %423 = vector.broadcast %422 : vector<8x1xf32> to vector<8x32xf32>
    %424 = arith.subf %416, %423 : vector<8x32xf32>
    %425 = arith.mulf %424, %424 : vector<8x32xf32>
    %cst_116 = arith.constant dense<0.000000e+00> : vector<8xf32>
    %426 = vector.multi_reduction <add>, %425, %cst_116 [1] : vector<8x32xf32> to vector<8xf32>
    %427 = vector.shape_cast %426 : vector<8xf32> to vector<8x1xf32>
    %cst_117 = arith.constant 3.200000e+01 : f32
    %428 = vector.broadcast %cst_117 : f32 to vector<8x1xf32>
    %429 = arith.divf %427, %428 : vector<8x1xf32>
    %430 = vector.broadcast %422 : vector<8x1xf32> to vector<8x32xf32>
    %431 = arith.subf %416, %430 : vector<8x32xf32>
    %cst_118 = arith.constant 9.99999974E-6 : f32
    %432 = vector.broadcast %cst_118 : f32 to vector<8x1xf32>
    %433 = arith.addf %429, %432 : vector<8x1xf32>
    %434 = math.rsqrt %433 : vector<8x1xf32>
    %435 = vector.broadcast %434 : vector<8x1xf32> to vector<8x32xf32>
    %436 = arith.mulf %431, %435 : vector<8x32xf32>
    %437 = vector.broadcast %417 : vector<1x32xf32> to vector<8x32xf32>
    %438 = arith.mulf %436, %437 : vector<8x32xf32>
    %439 = vector.broadcast %418 : vector<1x32xf32> to vector<8x32xf32>
    %440 = arith.addf %438, %439 : vector<8x32xf32>
    %441 = vector.shape_cast %440 : vector<8x32xf32> to vector<1x8x32xf32>
    %c0_119 = arith.constant 0 : index
    %c0_120 = arith.constant 0 : index
    %c0_121 = arith.constant 0 : index
    %442 = vector.load %arg12[%c0_119, %c0_120, %c0_121] : memref<1x8x32xf32, #tpu.memory_space<vmem>>, vector<1x8x32xf32>
    tpu.vector_store %arg12[%c0_119, %c0_120, %c0_121], %441 {strides = array<i32>} : memref<1x8x32xf32, #tpu.memory_space<vmem>>, vector<1x8x32xf32>,
    return
  }
  func.func @transform_0(%arg0: i32) -> (i32, i32, i32) {
    %c0_i32 = arith.constant 0 : i32
    %c0_i32_0 = arith.constant 0 : i32
    %c0_i32_1 = arith.constant 0 : i32
    return %arg0, %c0_i32, %c0_i32_0 : i32, i32, i32
  }
  func.func @transform_1(%arg0: i32) -> (i32, i32, i32) {
    %c0_i32 = arith.constant 0 : i32
    %c0_i32_0 = arith.constant 0 : i32
    %c0_i32_1 = arith.constant 0 : i32
    return %arg0, %c0_i32, %c0_i32_0 : i32, i32, i32
  }
  func.func @transform_2(%arg0: i32) -> (i32, i32) {
    %c0_i32 = arith.constant 0 : i32
    %c0_i32_0 = arith.constant 0 : i32
    %c0_i32_1 = arith.constant 0 : i32
    return %c0_i32, %c0_i32_0 : i32, i32
  }
  func.func @transform_3(%arg0: i32) -> (i32, i32) {
    %c0_i32 = arith.constant 0 : i32
    %c0_i32_0 = arith.constant 0 : i32
    %c0_i32_1 = arith.constant 0 : i32
    return %c0_i32, %c0_i32_0 : i32, i32
  }
  func.func @transform_4(%arg0: i32) -> (i32, i32) {
    %c0_i32 = arith.constant 0 : i32
    %c0_i32_0 = arith.constant 0 : i32
    %c0_i32_1 = arith.constant 0 : i32
    return %c0_i32, %c0_i32_0 : i32, i32
  }
  func.func @transform_5(%arg0: i32) -> (i32, i32) {
    %c0_i32 = arith.constant 0 : i32
    %c0_i32_0 = arith.constant 0 : i32
    %c0_i32_1 = arith.constant 0 : i32
    return %c0_i32, %c0_i32_0 : i32, i32
  }
  func.func @transform_6(%arg0: i32) -> (i32, i32) {
    %c0_i32 = arith.constant 0 : i32
    %c0_i32_0 = arith.constant 0 : i32
    %c0_i32_1 = arith.constant 0 : i32
    return %c0_i32, %c0_i32_0 : i32, i32
  }
  func.func @transform_7(%arg0: i32) -> (i32, i32) {
    %c0_i32 = arith.constant 0 : i32
    %c0_i32_0 = arith.constant 0 : i32
    %c0_i32_1 = arith.constant 0 : i32
    return %c0_i32, %c0_i32_0 : i32, i32
  }
  func.func @transform_8(%arg0: i32) -> (i32, i32) {
    %c0_i32 = arith.constant 0 : i32
    %c0_i32_0 = arith.constant 0 : i32
    %c0_i32_1 = arith.constant 0 : i32
    return %c0_i32, %c0_i32_0 : i32, i32
  }
  func.func @transform_9(%arg0: i32) -> (i32, i32) {
    %c0_i32 = arith.constant 0 : i32
    %c0_i32_0 = arith.constant 0 : i32
    %c0_i32_1 = arith.constant 0 : i32
    return %c0_i32, %c0_i32_0 : i32, i32
  }
  func.func @transform_10(%arg0: i32) -> (i32, i32) {
    %c0_i32 = arith.constant 0 : i32
    %c0_i32_0 = arith.constant 0 : i32
    %c0_i32_1 = arith.constant 0 : i32
    return %c0_i32, %c0_i32_0 : i32, i32
  }
  func.func @transform_11(%arg0: i32) -> (i32, i32, i32) {
    %c0_i32 = arith.constant 0 : i32
    %c0_i32_0 = arith.constant 0 : i32
    %c0_i32_1 = arith.constant 0 : i32
    return %arg0, %c0_i32, %c0_i32_0 : i32, i32, i32
  }
}

</mosaic_0001>

<bundles_post_ra>
// kernel: tpu_custom_call.1
= control target key start
LH: loop header
LB: loop body
LE: loop exit
PB: predicated region body
PF: predicated region fallthrough
CT: control target
= control target key end

     0   :  { %s3299_s0 = inlined_call_operand.vmem [shape: f32[2,8,32], index: 0, kind: input, shape index: {}]   ;;  %s3300_s1 = inlined_call_operand.vmem [shape: f32[2,1,8], index: 1, kind: input, shape index: {}]   ;;  %s3301_s2 = inlined_call_operand.vmem [shape: f32[32,128], index: 2, kind: input, shape index: {}]   ;;  %s3302_s3 = inlined_call_operand.vmem [shape: f32[32,128], index: 3, kind: input, shape index: {}]   ;;  %s3303_s4 = inlined_call_operand.vmem [shape: f32[128,32], index: 4, kind: input, shape index: {}]   ;;  %s3304_s5 = inlined_call_operand.vmem [shape: f32[32,64], index: 5, kind: input, shape index: {}]   ;;  %s3305_s6 = inlined_call_operand.vmem [shape: f32[32,32], index: 6, kind: input, shape index: {}]   ;;  %s3306_s7 = inlined_call_operand.vmem [shape: f32[32,96], index: 7, kind: input, shape index: {}]   ;;  %s3307_s8 = inlined_call_operand.vmem [shape: f32[32,32], index: 8, kind: input, shape index: {}]   ;;  %s3308_s9 = inlined_call_operand.vmem [shape: f32[32,128], index: 9, kind: input, shape index: {}]   ;;  %s3309_s10 = inlined_call_operand.vmem [shape: f32[128,32], index: 10, kind: input, shape index: {}]   ;;  %s3310_s11 = inlined_call_operand.hbm [shape: f32[2,8,32], index: 11, kind: output, shape index: {}]  }
   0x1   :  { %3312 = sst [smem:[#allocation6_spill]] %s3299_s0 }
   0x2   :  { %16 = vsyncpa [#allocation4], 0 }
   0x3   :  { %18 = vsyncpa [#allocation4 + $0x1], 0  ;;  %s2750_s17 = smov 0   ;;  %s2752_s18 = smov 0  }
   0x4   :  { %s2754_s19 = smov 0   ;;  %s2756_s20 = smov 0  }
   0x5 LB: > { %s2771_s21 = sadd.s32 4294967295, %s2675_s20   ;;  %s2148_s22 = sadd.s32 4294967294, %s2675_s20   ;;  %s2675_s20 = sphi %s2756_s20, %s3322_s20   ;;  %s2671_s19 = sphi %s2754_s19, %s3321_s19   ;;  %s2667_s18 = sphi %s2752_s18, %s3320_s18   ;;  %s2663_s17 = sphi %s2750_s17, %s3319_s17  }
   0x6   : > { %s2775_s23 = sadd.s32 1, %s2675_s20   ;;  %s272_s24 = sadd.s32 1, %s2671_s19 }
   0x7   : > { %s269_s25 = ssub.s32 %s2675_s20, %s2775_s23  ;;  %p282_p0 = scmp.ne.s32.totalorder %s2671_s19, %s2667_s18 }
   0x8   : > { %p270_p1 = scmp.eq.s32.totalorder %s269_s25, 0  ;;  %p283_p2 = scmp.eq.s32.totalorder %s2771_s21, 1 }
   0x9   : > { %p288_p3 = scmp.ne.s32.totalorder %s2667_s18, %s2663_s17  ;;  %p289_p4 = scmp.eq.s32.totalorder %s2148_s22, 1 }
   0xa   : > { %s2786_s26 = scalar_select %p270_p1, %s2671_s19, %s272_s24  }
   0xb   : > { %p2788_p5 = por %p283_p2, %p282_p0  ;;  %p2792_p6 = por %p289_p4, %p288_p3 }
   0xc   : > { %p2151_p7 = scmp.ge.s32.totalorder %s2675_s20, 1  ;;  %p347_p8 = scmp.lt.s32.totalorder %s2675_s20, 3 }
   0xe   : > { %p348_p9 = pnand %p2151_p7, %p347_p8 }
   0xf   : > { %p389_p10 = scmp.lt.s32.totalorder (!%p348_p9), %s2771_s21, 1  ;;  %vm402_vm0 = vcmask (!%p348_p9), 261120   ;;  %s3315_s0 = sld [smem:[#allocation6_spill]] (!%p348_p9)  ;;  %v2818_v8 = vld [vmem:[%s3301_s2 + $0x8] sm:$0xff] (!%p348_p9)  ;;  %v2823_v9 = vld [vmem:[%s3301_s2 + $0x10] sm:$0xff] (!%p348_p9)  ;;  %v2828_v10 = vld [vmem:[%s3301_s2 + $0x18] sm:$0xff] (!%p348_p9)  ;;  %v417_v21 = vlaneseq (!%p348_p9) }
  0x10   : > { %351 = sbr.rel (%p348_p9) target bundleno = 4696 (0x1258), region = 64  ;;  %s3311_s24 = sand.u32 (!%p348_p9), 1, %s2667_s18   ;;  %v2677_v11 = vmov (!%p348_p9), 0.0|0.0   ;;  %v427_v12 = vld [vmem:[%s3302_s3] sm:$0xff] (!%p348_p9)  ;;  %v428_v13 = vld [vmem:[%s3302_s3 + $0x8] sm:$0xff] (!%p348_p9)  ;;  %v429_v14 = vld [vmem:[%s3302_s3 + $0x10] sm:$0xff] (!%p348_p9) }
  0x11   : > { %s2832_s15 = sshll.u32 (!%p348_p9), %s3311_s24, 3  ;;  %2434 = vmatprep.subr.bf16.mxu1 (!%p348_p9), %v2677_v11  ;;  %v2435_v15 = vpack.c.bf16 (!%p348_p9), %v428_v13, %v427_v12  ;;  %v430_v16 = vld [vmem:[%s3302_s3 + $0x18] sm:$0xff] (!%p348_p9)  ;;  %vm2678_vm1 = vmmov (!%p348_p9), 0   ;;  %v2679_v17 = vmov (!%p348_p9), 0.0   ;;  %v2851_v23 = vshrl.u32 (!%p348_p9), %v417_v21, 7  ;;  %v2859_v25 = vld [vmem:[%s3301_s2] sm:$0xff] (!%p348_p9) }
  0x12   : > { %2266 = vmatprep.mubr.msk.f32.mxu1 (!%p348_p9), %vm2678_vm1, %v2679_v17  ;;  %v2438_v18 = vpack.c.bf16 (!%p348_p9), %v430_v16, %v429_v14  ;;  %v515_v33 = vld [vmem:[%s3303_s4] sm:$0xff] (!%p348_p9)  ;;  %v516_v34 = vld [vmem:[%s3303_s4 + $0x8] sm:$0xff] (!%p348_p9)  ;;  %v517_v36 = vld [vmem:[%s3303_s4 + $0x10] sm:$0xff] (!%p348_p9)  ;;  %s2680_s25 = smov (!%p348_p9), 96   ;;  %p2156_p11 = scmp.ne.s32.totalorder (!%p348_p9), %s2771_s21, 0 }
  0x13   : > { %2436 = vmatpush3.bf16.msra.mxu1 (!%p348_p9), %v2435_v15  ;;  %v2854_v24 = vsub.s32 (!%p348_p9), 0, %v2851_v23  ;;  %v2862_v26 = vsub.s32 (!%p348_p9), 1, %v2851_v23  ;;  %v2441_v35 = vpack.c.bf16 (!%p348_p9), %v516_v34, %v515_v33  ;;  %v518_v37 = vld [vmem:[%s3303_s4 + $0x18] sm:$0xff] (!%p348_p9)  ;;  %v519_v39 = vld [vmem:[%s3303_s4 + $0x20] sm:$0xff] (!%p348_p9)  ;;  %v520_v40 = vld [vmem:[%s3303_s4 + $0x28] sm:$0xff] (!%p348_p9)  ;;  %v2928_v57 = vsub.s32 (!%p348_p9), 2, %v2851_v23 }
  0x14   : > { %2437 = vmatprep.subr.bf16.mxu1 (!%p348_p9), %v2677_v11  ;;  %v2444_v38 = vpack.c.bf16 (!%p348_p9), %v518_v37, %v517_v36  ;;  %v2447_v41 = vpack.c.bf16 (!%p348_p9), %v520_v40, %v519_v39  ;;  %v521_v42 = vld [vmem:[%s3303_s4 + $0x30] sm:$0xff] (!%p348_p9)  ;;  %v522_v43 = vld [vmem:[%s3303_s4 + $0x38] sm:$0xff] (!%p348_p9)  ;;  %v523_v45 = vld [vmem:[%s3303_s4 + $0x40] sm:$0xff] (!%p348_p9)  ;;  %v2960_v36 = vsub.s32 (!%p348_p9), 4, %v2851_v23  ;;  %v2963_v37 = vsub.s32 (!%p348_p9), 5, %v2851_v23 }
  0x15   : > { %v420_v27 = vrot.slane (!%p348_p9), %v2859_v25, %v2854_v24  ;;  %v425_v30 = vrot.slane (!%p348_p9), %v2859_v25, %v2862_v26  ;;  %v2450_v44 = vpack.c.bf16 (!%p348_p9), %v522_v43, %v521_v42  ;;  %v524_v46 = vld [vmem:[%s3303_s4 + $0x48] sm:$0xff] (!%p348_p9)  ;;  %v525_v48 = vld [vmem:[%s3303_s4 + $0x50] sm:$0xff] (!%p348_p9)  ;;  %v526_v49 = vld [vmem:[%s3303_s4 + $0x58] sm:$0xff] (!%p348_p9)  ;;  %v434_v58 = vrot.slane (!%p348_p9), %v2859_v25, %v2928_v57 }
  0x16   : > { %v2453_v47 = vpack.c.bf16 (!%p348_p9), %v524_v46, %v523_v45  ;;  %v2456_v50 = vpack.c.bf16 (!%p348_p9), %v526_v49, %v525_v48  ;;  %v527_v51 = vld [vmem:[%s3303_s4 + $0x60] sm:$0xff] (!%p348_p9)  ;;  %v528_v52 = vld [vmem:[%s3303_s4 + $0x68] sm:$0xff] (!%p348_p9)  ;;  %v529_v54 = vld [vmem:[%s3303_s4 + $0x70] sm:$0xff] (!%p348_p9) }
  0x17   : > { %s390_s29 = scalar_select %p389_p10, %s2771_s21, 1  ;;  %2439 = vmatpush3.bf16.msra.mxu1 %v2438_v18  ;;  %v2459_v53 = vpack.c.bf16 %v528_v52, %v527_v51  ;;  %v530_v55 = vld [vmem:[%s3303_s4 + $0x78] sm:$0xff] }
  0x18   : > { %2440 = vmatprep.subr.bf16.mxu1 %v2677_v11  ;;  %v2462_v56 = vpack.c.bf16 %v530_v55, %v529_v54 }
  0x19   : > { %s2153_s30 = sshll.u32 %s390_s29, 3  ;;  %s395_s14 = scalar_lea.vmem %s3300_s1, %s390_s29 }
  0x1a   : > { %s392_s22 = scalar_lea.vmem %s3315_s0, %s2153_s30  ;;  %v2806_v0 = vld [vmem:[%s395_s14] ss:$0 sm:$0xff] }
  0x1b   : > { %v2808_v1 = vld [vmem:[%s392_s22] sm:$0xff] }
  0x1c   : > { %v403_v2 = vsel %vm402_vm0, %v2808_v1, 0.0 }
  0x1d   : > { %404 = vadd.xlane.f32.xlu0 %v403_v2 }
  0xaa   : > { %v405_v3 = vpop.xlane.xlu0 %404 }
  0xab   : > { %v407_v4 = vmul.f32 0.03125, %v405_v3 }
  0xad   : > { %v408_v5 = vsub.f32 %v2808_v1, %v407_v4 }
  0xaf   : > { %v409_v6 = vmul.f32 %v408_v5, %v408_v5 }
  0xb1   : > { %v410_v7 = vsel %vm402_vm0, %v409_v6, 0.0  ;;  %v2935_v6 = vsub.s32 3, %v2851_v23 }
  0xb2   : > { %411 = vadd.xlane.f32.xlu0 %v410_v7 }
  0xb3   : > { %v534_v7 = vrot.slane %v2859_v25, %v2935_v6 }
 0x13f   : > { %v412_v19 = vpop.xlane.xlu0 %411 }
 0x140   : > { %v413_v20 = vmul.f32 0.03125, %v412_v19 }
 0x142   : > { %v414_v22 = vadd.f32 1e-05, %v413_v20 }
 0x144   : > { %2569 = vrsqrt.f32 %v414_v22 }
 0x14e   : > { %v2570_v28 = vpop.eup %2569 }
 0x14f   : > { %v416_v29 = vmul.f32 %v2570_v28, %v408_v5  ;;  %v630_v28 = vld [vmem:[%s3304_s5] sm:$0xff] }
 0x151   : > { %v421_v31 = vmul.f32 %v420_v27, %v416_v29 }
 0x153   : > { %v426_v32 = vadd.f32 %v425_v30, %v421_v31  ;;  %v632_v30 = vld [vmem:[%s3304_s5 + $0x10] sm:$0xff]  ;;  %v633_v31 = vld [vmem:[%s3304_s5 + $0x18] sm:$0xff] }
 0x155   : > { %2267 = vmatmul.mubr.msk.f32.vlgmr.msra.gmra.mrb[0].mxu1 %vm402_vm0, %v426_v32  ;;  %v2468_v32 = vpack.c.bf16 %v633_v31, %v632_v30 }
 0x156   : > { %2301 = vmatprep.mubr.msk.f32.mxu1 %vm2678_vm1, %v2679_v17  ;;  %2442 = vmatpush3.bf16.msra.mxu1 %v2441_v35 }
 0x157   : > { %2443 = vmatprep.subr.bf16.mxu1 %v2677_v11 }
 0x15a   : > { %2445 = vmatpush3.bf16.msra.mxu1 %v2444_v38  ;;  %v623_v38 = vrot.slane %v2859_v25, %v2960_v36 }
 0x15b   : > { %2446 = vmatprep.subr.bf16.mxu1 %v2677_v11 }
 0x15e   : > { %2448 = vmatpush3.bf16.msra.mxu1 %v2447_v41  ;;  %v628_v41 = vrot.slane %v2859_v25, %v2963_v37 }
 0x15f   : > { %2449 = vmatprep.subr.bf16.mxu1 %v2677_v11 }
 0x162   : > { %2451 = vmatpush3.bf16.msra.mxu1 %v2450_v44  ;;  %v2971_v44 = vsub.s32 6, %v2851_v23 }
 0x163   : > { %2452 = vmatprep.subr.bf16.mxu1 %v2677_v11 }
 0x164   : > { %v637_v45 = vrot.slane %v2859_v25, %v2971_v44 }
 0x166   : > { %2454 = vmatpush3.bf16.msra.mxu1 %v2453_v47 }
 0x167   : > { %2455 = vmatprep.subr.bf16.mxu1 %v2677_v11 }
 0x16a   : > { %2457 = vmatpush3.bf16.msra.mxu1 %v2456_v50 }
 0x16b   : > { %2458 = vmatprep.subr.bf16.mxu1 %v2677_v11 }
 0x16e   : > { %2460 = vmatpush3.bf16.msra.mxu1 %v2459_v53 }
 0x16f   : > { %2461 = vmatprep.subr.bf16.mxu1 %v2677_v11 }
 0x172   : > { %2463 = vmatpush3.bf16.msra.mxu1 %v2462_v56  ;;  %v2681_v56 = vmov (!%p2156_p11), 0.0  }
 0x173   : > { %2464 = vmatprep.subr.bf16.mxu1 %v2677_v11  ;;  %726 = vst.msk [vmem:[#allocation2] sm:$0xff] (!%p2156_p11), %vm402_vm0, %v2681_v56  ;;  %727 = vst.msk [vmem:[#allocation2 + $0x10] sm:$0xff] (!%p2156_p11), %vm402_vm0, %v2681_v56 }
 0x228   : > { %v504_v59 = vpop.f32.mrb[0].mxu1 }
 0x229   : > { %v505_v60 = vadd.f32 %v504_v59, %v434_v58  ;;  %v2268_v61 = vpop.f32.mrb[1].mxu1 }
 0x22b   : > { %v508_v62 = vsub.f32 0.0, %v505_v60 }
 0x22d   : > { %v509_v63 = vmul.f32 1.442695, %v508_v62 }
 0x22f   : > { %2571 = vpow2.f32 %v509_v63 }
 0x239   : > { %v2572_v2 = vpop.eup %2571 }
 0x23a   : > { %v511_v3 = vadd.f32 1.0, %v2572_v2 }
 0x23c   : > { %2573 = vrcp.f32 %v511_v3 }
 0x246   : > { %v2574_v4 = vpop.eup %2573 }
 0x247   : > { %v514_v5 = vmul.f32 %v2574_v4, %v505_v60 }
 0x249   : > { %2302 = vmatmul.mubr.f32.vlgmr.msra.gmra.mrb[2].mxu1 %v514_v5 }
 0x24a   : > { %2312 = vmatprep.mubr.msk.f32.mxu1 %vm2678_vm1, %v2679_v17 }
 0x31c   : > { %v601_v12 = vpop.f32.mrb[2].mxu1 }
 0x31d   : > { %v602_v13 = vadd.f32 %v601_v12, %v534_v7  ;;  %v2303_v14 = vpop.f32.mrb[3].mxu1 }
 0x31f   : > { %v605_v15 = vmul.f32 0.5, %v602_v13 }
 0x321   : > { %v2940_v16 = vadd.f32 %v605_v15, %v2808_v1  ;;  %v631_v1 = vld [vmem:[%s3304_s5 + $0x8] sm:$0xff] }
 0x322   : > { %v2465_v29 = vpack.c.bf16 %v631_v1, %v630_v28 }
 0x323   : > { %v607_v18 = vsel %vm402_vm0, %v2940_v16, 0.0 }
 0x324   : > { %608 = vadd.xlane.f32.xlu1 %v607_v18  ;;  %2466 = vmatpush3.bf16.msra.mxu1 %v2465_v29 }
 0x325   : > { %2467 = vmatprep.subr.bf16.mxu1 %v2677_v11 }
 0x328   : > { %2469 = vmatpush3.bf16.msra.mxu1 %v2468_v32 }
 0x3b1   : > { %v609_v19 = vpop.xlane.xlu1 %608 }
 0x3b2   : > { %v610_v20 = vmul.f32 0.03125, %v609_v19 }
 0x3b4   : > { %v611_v21 = vsub.f32 %v2940_v16, %v610_v20 }
 0x3b6   : > { %v612_v22 = vmul.f32 %v611_v21, %v611_v21 }
 0x3b8   : > { %v613_v27 = vsel %vm402_vm0, %v612_v22, 0.0 }
 0x3b9   : > { %614 = vadd.xlane.f32.xlu1 %v613_v27 }
 0x446   : > { %v615_v33 = vpop.xlane.xlu1 %614 }
 0x447   : > { %v616_v34 = vmul.f32 0.03125, %v615_v33 }
 0x449   : > { %v617_v35 = vadd.f32 1e-05, %v616_v34 }
 0x44b   : > { %2575 = vrsqrt.f32 %v617_v35 }
 0x455   : > { %v2576_v39 = vpop.eup %2575 }
 0x456   : > { %v619_v40 = vmul.f32 %v2576_v39, %v611_v21 }
 0x458   : > { %v624_v42 = vmul.f32 %v623_v38, %v619_v40 }
 0x45a   : > { %v629_v43 = vadd.f32 %v628_v41, %v624_v42 }
 0x45c   : > { %2313 = vmatmul.mubr.msk.f32.vlgmr.msra.gmra.mrb[4].mxu1 %vm402_vm0, %v629_v43 }
 0x52f   : > { %v707_v46 = vpop.f32.mrb[4].mxu1 }
 0x530   : > { %v708_v47 = vadd.f32 %v707_v46, %v637_v45  ;;  %v2314_v48 = vpop.f32.mrb[5].mxu1 }
 0x532   : > { %v711_v49 = vsub.f32 0.0, %v708_v47 }
 0x534   : > { %v712_v50 = vmul.f32 1.442695, %v711_v49 }
 0x536   : > { %2577 = vpow2.f32 %v712_v50 }
 0x540   : > { %v2578_v51 = vpop.eup %2577 }
 0x541   : > { %v714_v52 = vadd.f32 1.0, %v2578_v51 }
 0x543   : > { %2579 = vrcp.f32 %v714_v52 }
 0x54d   : > { %v2580_v53 = vpop.eup %2579 }
 0x54e   : > { %718 = vrot.lane.b32.xlu0 %v2580_v53, %s2680_s25 }
 0x5bb   : > { %725 = sbr.rel (%p2156_p11) target bundleno = 1474 (0x5c2), region = 68 }
 0x5c0   : > { %v719_v54 = vpop.permute.xlu0 %718 }
 0x5c1   : > { %v721_v55 = vmul.f32 %v719_v54, %v708_v47 }
 0x5c2 PF: > { %2470 = vmatprep.subr.bf16.mxu0 %v2677_v11  ;;  %v873_v58 = vld [vmem:[%s3305_s6] sm:$0xff]  ;;  %v874_v59 = vld [vmem:[%s3305_s6 + $0x8] sm:$0xff]  ;;  %v875_v60 = vld [vmem:[%s3305_s6 + $0x10] sm:$0xff]  ;;  %2323 = vmatprep.mubr.msk.f32.mxu0 %vm2678_vm1, %v2679_v17  ;;  %v735_v61 = vand.u32 7, %v2851_v23  ;;  %v2995_v62 = vsub.s32 7, %v2851_v23  ;;  %v772_v12 = vrot.slane %v2818_v8, %v2854_v24  ;;  %v746_v15 = vrot.slane %v2818_v8, %v2971_v44  ;;  %s2682_s24 = smov 104  }
 0x5c3   : > { %728 = vst.msk [vmem:[#allocation2 + $0x8] sm:$0xff] %vm402_vm0, %v721_v55  ;;  %v2471_v63 = vpack.c.bf16 %v874_v59, %v873_v58  ;;  %v876_v2 = vld [vmem:[%s3305_s6 + $0x18] sm:$0xff]  ;;  %2342 = vmatprep.subr.mxu1 %v2679_v17  ;;  %2344 = vmatprep.mubr.msk.f32.mxu1 %vm2678_vm1, %v2679_v17  ;;  %v849_v14 = vadd.f32 1e-05, %v2823_v9  ;;  %v786_v21 = vrot.slane %v2818_v8, %v2862_v26  ;;  %s2683_s29 = smov 120   ;;  %s2684_s13 = smov 112  }
 0x5c4   : > { %v748_v3 = vadd.s32 4294967293, %v735_v61  ;;  %v762_v4 = vadd.s32 4294967294, %v735_v61  ;;  %v2474_v5 = vpack.c.bf16 %v876_v2, %v875_v60  ;;  %v776_v7 = vadd.s32 4294967295, %v735_v61  ;;  %s2687_s14 = smov 16   ;;  %s2688_s16 = smov 24  }
 0x5c5   : > { %2472 = vmatpush3.bf16.msra.mxu0 %v2471_v63  ;;  %v758_v23 = vrot.slane %v2859_v25, %v2995_v62  ;;  %v803_v13 = vadd.s32 1, %v735_v61  ;;  %v817_v25 = vadd.s32 2, %v735_v61  ;;  %v799_v1 = vrot.slane %v2818_v8, %v2928_v57  ;;  %s3318_s12 = sand.u32 1, %s2667_s18  }
 0x5c6   : > { %2473 = vmatprep.subr.bf16.mxu0 %v2677_v11  ;;  %vm749_vm2 = vcmp.ge.s32.totalorder %v748_v3, 0  ;;  %vm763_vm3 = vcmp.ge.s32.totalorder %v762_v4, 0  ;;  %vm777_vm4 = vcmp.ge.s32.totalorder %v776_v7, 0  ;;  %v831_v32 = vadd.s32 3, %v735_v61 }
 0x5c7   : > { %vm805_vm5 = vcmp.lt.s32.totalorder %v803_v13, 8  ;;  %2581 = vrsqrt.f32 %v849_v14  ;;  %v813_v38 = vrot.slane %v2818_v8, %v2935_v6  ;;  %vm819_vm6 = vcmp.lt.s32.totalorder %v817_v25, 8 }
 0x5c8   : > { %v827_v43 = vrot.slane %v2818_v8, %v2960_v36  ;;  %vm833_vm7 = vcmp.lt.s32.totalorder %v831_v32, 8  ;;  %v841_v49 = vrot.slane %v2818_v8, %v2963_v37  ;;  %v847_v58 = vrot.slane %v2823_v9, %v2862_v26 }
 0x5c9   : > { %2475 = vmatpush3.bf16.msra.mxu0 %v2474_v5  ;;  %v859_v63 = vrot.slane %v2818_v8, %v2995_v62  ;;  %v864_v3 = vrot.slane %v2823_v9, %v2854_v24  ;;  %v880_v8 = vrot.slane %v2823_v9, %v2935_v6  ;;  %vm1075_vm8 = vcmask 64512  }
 0x5ca   : > { %v747_v18 = vld [vmem:[#allocation2 + $0x5] sm:$0xff]  ;;  %2476 = vmatprep.subr.bf16.mxu0 %v2677_v11  ;;  %vm1753_vm9 = vcmask 130048   ;;  %vm1755_vm10 = vcmask 195584  }
 0x5cb   : > { %v761_v19 = vld [vmem:[#allocation2 + $0x6] sm:$0xff]  ;;  %v754_v22 = vsel %vm749_vm2, %v747_v18, 0.0 }
 0x5cc   : > { %v775_v20 = vld [vmem:[#allocation2 + $0x7] sm:$0xff]  ;;  %v768_v27 = vsel %vm763_vm3, %v761_v19, 0.0  ;;  %v759_v29 = vmul.f32 %v758_v23, %v754_v22 }
 0x5cd   : > { %v782_v28 = vsel %vm777_vm4, %v775_v20, 0.0  ;;  %v773_v30 = vmul.f32 %v772_v12, %v768_v27  ;;  %v802_v31 = vld [vmem:[#allocation2 + $0x9] sm:$0xff] }
 0x5ce   : > { %v789_v33 = vld [vmem:[#allocation2 + $0x8] sm:$0xff]  ;;  %v760_v34 = vadd.f32 %v759_v29, %v746_v15  ;;  %v787_v35 = vmul.f32 %v786_v21, %v782_v28  ;;  %v809_v40 = vsel %vm805_vm5, %v802_v31, 0.0  ;;  %v980_v31 = vld [vmem:[%s3306_s7 + $0x10] sm:$0xff] }
 0x5cf   : > { %v816_v39 = vld [vmem:[#allocation2 + $0xa] sm:$0xff]  ;;  %v800_v42 = vmul.f32 %v799_v1, %v789_v33  ;;  %v814_v48 = vmul.f32 %v813_v38, %v809_v40  ;;  %v981_v33 = vld [vmem:[%s3306_s7 + $0x18] sm:$0xff]  ;;  %v971_v40 = vrot.slane %v2823_v9, %v2960_v36 }
 0x5d0   : > { %v774_v41 = vadd.f32 %v773_v30, %v760_v34  ;;  %v830_v45 = vld [vmem:[#allocation2 + $0xb] sm:$0xff]  ;;  %v823_v46 = vsel %vm819_vm6, %v816_v39, 0.0  ;;  %v978_v30 = vld [vmem:[%s3306_s7] sm:$0xff]  ;;  %v2480_v34 = vpack.c.bf16 %v981_v33, %v980_v31 }
 0x5d1   : > { %v837_v50 = vsel %vm833_vm7, %v830_v45, 0.0  ;;  %v828_v52 = vmul.f32 %v827_v43, %v823_v46  ;;  %v2582_v55 = vpop.eup %2581  ;;  %v976_v43 = vrot.slane %v2823_v9, %v2963_v37 }
 0x5d2   : > { %v788_v47 = vadd.f32 %v787_v35, %v774_v41  ;;  %v842_v54 = vmul.f32 %v841_v49, %v837_v50  ;;  %v854_v60 = vrot.slane %v2582_v55, %v2928_v57 }
 0x5d4   : > { %v801_v51 = vadd.f32 %v800_v42, %v788_v47  ;;  %v985_v47 = vrot.slane %v2823_v9, %v2971_v44 }
 0x5d6   : > { %v815_v53 = vadd.f32 %v814_v48, %v801_v51 }
 0x5d8   : > { %v829_v56 = vadd.f32 %v828_v52, %v815_v53 }
 0x5da   : > { %v843_v59 = vadd.f32 %v842_v54, %v829_v56 }
 0x5dc   : > { %v848_v61 = vsub.f32 %v843_v59, %v847_v58 }
 0x5de   : > { %v855_v2 = vmul.f32 %v854_v60, %v848_v61 }
 0x5e0   : > { %v860_v4 = vmul.f32 %v859_v63, %v855_v2 }
 0x5e2   : > { %v865_v5 = vadd.f32 %v864_v3, %v860_v4 }
 0x5e4   : > { %v866_v7 = vsub.f32 0.0, %v865_v5 }
 0x5e6   : > { %v867_v23 = vmul.f32 1.442695, %v866_v7 }
 0x5e8   : > { %2583 = vpow2.f32 %v867_v23 }
 0x5f2   : > { %v2584_v12 = vpop.eup %2583 }
 0x5f3   : > { %v869_v13 = vadd.f32 1.0, %v2584_v12 }
 0x5f5   : > { %2585 = vrcp.f32 %v869_v13 }
 0x5ff   : > { %v2586_v14 = vpop.eup %2585 }
 0x600   : > { %v872_v15 = vmul.f32 %v2586_v14, %v865_v5 }
 0x602   : > { %2324 = vmatmul.mubr.msk.f32.vlgmr.msra.gmra.mrb[0].mxu0 %vm402_vm0, %v872_v15 }
 0x603   : > { %2334 = vmatprep.mubr.msk.f32.mxu0 %vm2678_vm1, %v2679_v17 }
 0x6d5   : > { %v950_v18 = vpop.f32.mrb[0].mxu0 }
 0x6d6   : > { %v951_v19 = vadd.f32 %v950_v18, %v880_v8  ;;  %v2325_v20 = vpop.f32.mrb[1].mxu0 }
 0x6d8   : > { %v3035_v21 = vadd.f32 %v951_v19, %v2940_v16  ;;  %v979_v16 = vld [vmem:[%s3306_s7 + $0x8] sm:$0xff] }
 0x6d9   : > { %v2477_v32 = vpack.c.bf16 %v979_v16, %v978_v30 }
 0x6da   : > { %v955_v25 = vsel %vm402_vm0, %v3035_v21, 0.0 }
 0x6db   : > { %956 = vadd.xlane.f32.xlu0 %v955_v25  ;;  %2478 = vmatpush3.bf16.msra.mxu0 %v2477_v32 }
 0x6dc   : > { %2479 = vmatprep.subr.bf16.mxu0 %v2677_v11 }
 0x6df   : > { %2481 = vmatpush3.bf16.msra.mxu0 %v2480_v34 }
 0x6e0   : > { %2337 = vmatprep.subr.mxu0 %v2679_v17 }
 0x768   : > { %v957_v22 = vpop.xlane.xlu0 %956 }
 0x769   : > { %v958_v27 = vmul.f32 0.03125, %v957_v22 }
 0x76b   : > { %v959_v28 = vsub.f32 %v3035_v21, %v958_v27 }
 0x76d   : > { %v960_v1 = vmul.f32 %v959_v28, %v959_v28 }
 0x76f   : > { %v961_v29 = vsel %vm402_vm0, %v960_v1, 0.0 }
 0x770   : > { %962 = vadd.xlane.f32.xlu0 %v961_v29 }
 0x7fd   : > { %v963_v35 = vpop.xlane.xlu0 %962 }
 0x7fe   : > { %v964_v38 = vmul.f32 0.03125, %v963_v35 }
 0x800   : > { %v965_v39 = vadd.f32 1e-05, %v964_v38 }
 0x802   : > { %2587 = vrsqrt.f32 %v965_v39 }
 0x80c   : > { %v2588_v41 = vpop.eup %2587 }
 0x80d   : > { %v967_v42 = vmul.f32 %v2588_v41, %v959_v28 }
 0x80f   : > { %v972_v45 = vmul.f32 %v971_v40, %v967_v42 }
 0x811   : > { %v977_v46 = vadd.f32 %v976_v43, %v972_v45 }
 0x813   : > { %2335 = vmatmul.mubr.msk.f32.vlgmr.msra.gmra.mrb[2].mxu0 %vm402_vm0, %v977_v46 }
 0x814   : > { %2339 = vmatprep.mubr.msk.f32.mxu0 %vm2678_vm1, %v2679_v17 }
 0x8e6   : > { %v1055_v48 = vpop.f32.mrb[2].mxu0 }
 0x8e7   : > { %v1056_v49 = vadd.f32 %v1055_v48, %v985_v47  ;;  %v2336_v50 = vpop.f32.mrb[3].mxu0 }
 0x8e9   : > { %1066 = vrot.lane.b32.xlu0 %v1056_v49, %s2682_s24  ;;  %1060 = vrot.lane.b32.xlu1 %v1056_v49, %s2683_s29  ;;  %v1069_v54 = vmul.f32 0.35355338, %v1056_v49  ;;  %s2175_s29 = sshll.u32 %s2771_s21, 7  ;;  %s2067_s24 = scalar_lea.sflag [#allocation4], %s3318_s12 }
 0x8ea   : > { %s3252_s22 = scalar_lea.hbm %s3310_s11, %s2175_s29 }
 0x8ed   : > { %1063 = vrot.lane.b32.xlu1 %v1056_v49, %s2684_s13  ;;  %s3316_s13 = scalar_lea.vmem [#allocation3], %s2832_s15 }
 0x8ee   : > { %s3317_s30 = smov %s3316_s13 }
 0x8f1   : > { %1073 = vrot.lane.b32.xlu1 %v1056_v49, %s2680_s25 }
 0x95b   : > { %v3065_v51 = vpop.permute.xlu1 %1060  ;;  %v3073_v44 = vpop.permute.xlu0 %1066 }
 0x95c   : > { %1151 = vrot.lane.b32.xlu1 %v3065_v51, %s2680_s25  ;;  %v1070_v56 = vmul.f32 0.35355338, %v3065_v51  ;;  %v1072_v61 = vmul.f32 0.35355338, %v3073_v44 }
 0x95f   : > { %v3069_v52 = vpop.permute.xlu1 %1063 }
 0x960   : > { %1228 = vrot.lane.b32.xlu1 %v3069_v52, %s2680_s25  ;;  %v1071_v59 = vmul.f32 0.35355338, %v3069_v52 }
 0x963   : > { %v1074_v53 = vpop.permute.xlu1 %1073 }
 0x964   : > { %1305 = vrot.lane.b32.xlu1 %v3073_v44, %s2680_s25  ;;  %2338 = vmatpush3.xpose.msk.msra.mxu0 %vm1075_vm8, %v1074_v53  ;;  %s2685_s25 = smov 64  }
 0x965   : > { %2347 = vmatprep.subr.mxu0 %v2679_v17 }
 0x967   : > { %2340 = vmatmul.mubr.msk.f32.vlgmr.msra.gmra.mrb[4].mxu0 %vm1075_vm8, %v1069_v54 }
 0x968   : > { %2349 = vmatprep.mubr.msk.f32.mxu0 %vm2678_vm1, %v2679_v17 }
 0x9ce   : > { %v1152_v55 = vpop.permute.xlu1 %1151 }
 0x9cf   : > { %2343 = vmatpush3.xpose.msk.msra.mxu1 %vm1075_vm8, %v1152_v55 }
 0x9d0   : > { %2352 = vmatprep.subr.mxu1 %v2679_v17 }
 0x9d2   : > { %2345 = vmatmul.mubr.msk.f32.vlgmr.msra.gmra.mrb[6].mxu1 %vm1075_vm8, %v1070_v56  ;;  %v1229_v58 = vpop.permute.xlu1 %1228 }
 0x9d3   : > { %2348 = vmatpush3.xpose.msk.msra.mxu0 %vm1075_vm8, %v1229_v58  ;;  %2354 = vmatprep.mubr.msk.f32.mxu1 %vm2678_vm1, %v2679_v17 }
 0x9d4   : > { %2357 = vmatprep.subr.mxu0 %v2679_v17 }
 0x9d6   : > { %v1306_v60 = vpop.permute.xlu1 %1305  ;;  %2350 = vmatmul.mubr.msk.f32.vlgmr.msra.gmra.mrb[6].mxu0 %vm1075_vm8, %v1071_v59 }
 0x9d7   : > { %2353 = vmatpush3.xpose.msk.msra.mxu1 %vm1075_vm8, %v1306_v60  ;;  %2359 = vmatprep.mubr.msk.f32.mxu0 %vm2678_vm1, %v2679_v17 }
 0x9d8   : > { %2362 = vmatprep.subr.mxu1 %v2679_v17 }
 0x9da   : > { %2355 = vmatmul.mubr.msk.f32.vlgmr.msra.gmra.mrb[8].mxu1 %vm1075_vm8, %v1072_v61 }
 0x9db   : > { %2364 = vmatprep.mubr.msk.f32.mxu1 %vm2678_vm1, %v2679_v17 }
 0xa3a   : > { %v1147_v63 = vpop.f32.mrb[4].mxu0 }
 0xa3b   : > { %v1388_v2 = vadd.f32 %v2806_v0, %v1147_v63  ;;  %v2341_v3 = vpop.f32.mrb[5].mxu0 }
 0xa3c   : > { %v1757_v3 = vld [vmem:[%s3307_s8] sm:$0xff] }
 0xa3d   : > { %v1392_v4 = vsel %vm1075_vm8, %v1388_v2, -inf }
 0xa3e   : > { %1393 = vmax.xlane.f32.xlu1 %v1392_v4  ;;  %v1758_v4 = vld [vmem:[%s3307_s8 + $0x8] sm:$0xff] }
 0xaa5   : > { %v1224_v5 = vpop.f32.mrb[6].mxu1 }
 0xaa6   : > { %v1389_v7 = vadd.f32 %v2806_v0, %v1224_v5  ;;  %v2346_v23 = vpop.f32.mrb[7].mxu1  ;;  %v2483_v5 = vpack.c.bf16 %v1758_v4, %v1757_v3  ;;  %v1960_v4 = vld [vmem:[%s3309_s10 + $0x50] sm:$0xff] }
 0xaa7   : > { %v1760_v23 = vld [vmem:[%s3307_s8 + $0x18] sm:$0xff] }
 0xaa8   : > { %v1395_v12 = vsel %vm1075_vm8, %v1389_v7, -inf }
 0xaa9   : > { %1396 = vmax.xlane.f32.xlu0 %v1395_v12  ;;  %v1301_v13 = vpop.f32.mrb[6].mxu0 }
 0xaaa   : > { %v1390_v14 = vadd.f32 %v2806_v0, %v1301_v13  ;;  %v2351_v15 = vpop.f32.mrb[7].mxu0 }
 0xaac   : > { %v1398_v8 = vsel %vm1075_vm8, %v1390_v14, -inf }
 0xaad   : > { %v1378_v18 = vpop.f32.mrb[8].mxu1  ;;  %1399 = vmax.xlane.f32.xlu1 %v1398_v8 }
 0xaae   : > { %v1391_v19 = vadd.f32 %v2806_v0, %v1378_v18  ;;  %v2356_v20 = vpop.f32.mrb[9].mxu1 }
 0xab0   : > { %v1401_v25 = vsel %vm1075_vm8, %v1391_v19, -inf }
 0xab1   : > { %1402 = vmax.xlane.f32.xlu0 %v1401_v25 }
 0xabe   : > { %1436 = vrot.lane.b32.xlu1 %v1056_v49, %s2685_s25 }
 0xacb   : > { %v1394_v22 = vpop.xlane.xlu1 %1393 }
 0xacc   : > { %v1404_v27 = vsub.f32 %v1388_v2, %v1394_v22 }
 0xace   : > { %v1408_v28 = vmul.f32 1.442695, %v1404_v27 }
 0xad0   : > { %2589 = vpow2.f32 %v1408_v28 }
 0xada   : > { %v2590_v1 = vpop.eup %2589 }
 0xadb   : > { %v1416_v29 = vsel %vm1075_vm8, %v2590_v1, 0.0 }
 0xae2   : > { %1417 = vadd.xlane.f32.xlu1 %v1416_v29  ;;  %v1764_v29 = vrot.slane %v2823_v9, %v2995_v62  ;;  %v1862_v9 = vld [vmem:[%s3308_s9] sm:$0xff]  ;;  %v1863_v62 = vld [vmem:[%s3308_s9 + $0x8] sm:$0xff] }
 0xb36   : > { %v1397_v30 = vpop.xlane.xlu0 %1396 }
 0xb37   : > { %v1405_v16 = vsub.f32 %v1389_v7, %v1397_v30  ;;  %v1759_v7 = vld [vmem:[%s3307_s8 + $0x10] sm:$0xff] }
 0xb38   : > { %v2486_v12 = vpack.c.bf16 %v1760_v23, %v1759_v7  ;;  %v1962_v23 = vld [vmem:[%s3309_s10 + $0x60] sm:$0xff] }
 0xb39   : > { %v1410_v31 = vmul.f32 1.442695, %v1405_v16 }
 0xb3a   : > { %v1400_v32 = vpop.xlane.xlu1 %1399 }
 0xb3b   : > { %2591 = vpow2.f32 %v1410_v31  ;;  %v1406_v0 = vsub.f32 %v1390_v14, %v1400_v32 }
 0xb3d   : > { %v1412_v33 = vmul.f32 1.442695, %v1406_v0 }
 0xb3e   : > { %v1403_v34 = vpop.xlane.xlu0 %1402  ;;  %v1437_v35 = vpop.permute.xlu1 %1436 }
 0xb3f   : > { %2593 = vpow2.f32 %v1412_v33  ;;  %v1407_v38 = vsub.f32 %v1391_v19, %v1403_v34  ;;  %2358 = vmatpush3.msra.mxu0 %v1437_v35 }
 0xb40   : > { %2367 = vmatprep.subr.mxu0 %v2679_v17 }
 0xb41   : > { %v1414_v39 = vmul.f32 1.442695, %v1407_v38 }
 0xb43   : > { %2595 = vpow2.f32 %v1414_v39  ;;  %v2489_v39 = vpack.c.bf16 %v1863_v62, %v1862_v9 }
 0xb45   : > { %v2592_v40 = vpop.eup %2591 }
 0xb46   : > { %v1419_v41 = vsel %vm1075_vm8, %v2592_v40, 0.0 }
 0xb47   : > { %1420 = vadd.xlane.f32.xlu0 %v1419_v41 }
 0xb49   : > { %v2594_v42 = vpop.eup %2593 }
 0xb4a   : > { %v1422_v43 = vsel %vm1075_vm8, %v2594_v42, 0.0 }
 0xb4b   : > { %1423 = vadd.xlane.f32.xlu1 %v1422_v43 }
 0xb4d   : > { %v2596_v45 = vpop.eup %2595 }
 0xb4e   : > { %v1425_v46 = vsel %vm1075_vm8, %v2596_v45, 0.0 }
 0xb4f   : > { %1426 = vadd.xlane.f32.xlu0 %v1425_v46  ;;  %v1855_v46 = vrot.slane %v2828_v10, %v2854_v24  ;;  %v1952_v24 = vld [vmem:[%s3309_s10 + $0x10] sm:$0xff] }
 0xb5c   : > { %1588 = vrot.lane.b32.xlu1 %v3069_v52, %s2685_s25 }
 0xb60   : > { %1664 = vrot.lane.b32.xlu1 %v3073_v44, %s2685_s25 }
 0xb65   : > { %1512 = vrot.lane.b32.xlu0 %v3065_v51, %s2685_s25  ;;  %s2686_s25 = smov 8  }
 0xb6f   : > { %v1418_v47 = vpop.xlane.xlu1 %1417 }
 0xb70   : > { %2597 = vrcp.f32 %v1418_v47 }
 0xb7a   : > { %v2598_v48 = vpop.eup %2597 }
 0xb7b   : > { %v1432_v49 = vmul.f32 %v2598_v48, %v2590_v1 }
 0xb7d   : > { %2360 = vmatmul.mubr.msk.f32.vlgmr.msra.gmra.mrb[8].mxu0 %vm1075_vm8, %v1432_v49  ;;  %v1860_v49 = vrot.slane %v2828_v10, %v2862_v26  ;;  %v1953_v26 = vld [vmem:[%s3309_s10 + $0x18] sm:$0xff] }
 0xb7e   : > { %2369 = vmatprep.mubr.msk.f32.mxu0 %vm2678_vm1, %v2679_v17 }
 0xbd4   : > { %v1421_v50 = vpop.xlane.xlu0 %1420 }
 0xbd5   : > { %2599 = vrcp.f32 %v1421_v50 }
 0xbd8   : > { %v1424_v53 = vpop.xlane.xlu1 %1423 }
 0xbd9   : > { %2601 = vrcp.f32 %v1424_v53 }
 0xbdc   : > { %v1427_v52 = vpop.xlane.xlu0 %1426  ;;  %v1589_v54 = vpop.permute.xlu1 %1588 }
 0xbdd   : > { %2603 = vrcp.f32 %v1427_v52  ;;  %2368 = vmatpush3.msra.mxu0 %v1589_v54  ;;  %v1950_v52 = vld [vmem:[%s3309_s10] sm:$0xff]  ;;  %v1951_v54 = vld [vmem:[%s3309_s10 + $0x8] sm:$0xff] }
 0xbde   : > { %2482 = vmatprep.subr.bf16.mxu0 %v2677_v11 }
 0xbdf   : > { %v2600_v51 = vpop.eup %2599 }
 0xbe0   : > { %v1433_v44 = vmul.f32 %v2600_v51, %v2592_v40  ;;  %v1513_v55 = vpop.permute.xlu0 %1512  ;;  %v1665_v56 = vpop.permute.xlu1 %1664  ;;  %v1865_v40 = vld [vmem:[%s3308_s9 + $0x18] sm:$0xff]  ;;  %v2495_v51 = vpack.c.bf16 %v1951_v54, %v1950_v52 }
 0xbe1   : > { %2363 = vmatpush3.msra.mxu1 %v1513_v55  ;;  %v1954_v55 = vld [vmem:[%s3309_s10 + $0x20] sm:$0xff] }
 0xbe2   : > { %2365 = vmatmul.mubr.msk.f32.vlgmr.msra.gmra.mrb[10].mxu1 %vm1075_vm8, %v1433_v44  ;;  %2372 = vmatprep.subr.mxu1 %v2679_v17  ;;  %v2498_v44 = vpack.c.bf16 %v1953_v26, %v1952_v24 }
 0xbe3   : > { %v2602_v58 = vpop.eup %2601  ;;  %2373 = vmatpush3.msra.mxu1 %v1665_v56  ;;  %2374 = vmatprep.mubr.msk.f32.mxu1 %vm2678_vm1, %v2679_v17  ;;  %v1955_v56 = vld [vmem:[%s3309_s10 + $0x28] sm:$0xff] }
 0xbe4   : > { %v1434_v59 = vmul.f32 %v2602_v58, %v2594_v42  ;;  %2488 = vmatprep.subr.bf16.mxu1 %v2677_v11  ;;  %v2501_v58 = vpack.c.bf16 %v1955_v56, %v1954_v55 }
 0xbe6   : > { %2370 = vmatmul.mubr.msk.f32.vlgmr.msra.gmra.mrb[10].mxu0 %vm1075_vm8, %v1434_v59  ;;  %v1956_v59 = vld [vmem:[%s3309_s10 + $0x30] sm:$0xff] }
 0xbe7   : > { %v2604_v60 = vpop.eup %2603  ;;  %2385 = vmatprep.mubr.msk.f32.mxu0 %vm2678_vm1, %v2679_v17  ;;  %2484 = vmatpush3.bf16.msra.mxu0 %v2483_v5  ;;  %v1961_v5 = vld [vmem:[%s3309_s10 + $0x58] sm:$0xff] }
 0xbe8   : > { %v1435_v61 = vmul.f32 %v2604_v60, %v2596_v45  ;;  %2485 = vmatprep.subr.bf16.mxu0 %v2677_v11  ;;  %v1957_v60 = vld [vmem:[%s3309_s10 + $0x38] sm:$0xff]  ;;  %v2510_v7 = vpack.c.bf16 %v1961_v5, %v1960_v4 }
 0xbea   : > { %2375 = vmatmul.mubr.msk.f32.vlgmr.msra.gmra.mrb[12].mxu1 %vm1075_vm8, %v1435_v61  ;;  %v2504_v61 = vpack.c.bf16 %v1957_v60, %v1956_v59 }
 0xbeb   : > { %2396 = vmatprep.mubr.msk.f32.mxu1 %vm2678_vm1, %v2679_v17  ;;  %2487 = vmatpush3.bf16.msra.mxu0 %v2486_v12  ;;  %v1963_v12 = vld [vmem:[%s3309_s10 + $0x68] sm:$0xff] }
 0xbec   : > { %2494 = vmatprep.subr.bf16.mxu0 %v2677_v11  ;;  %2490 = vmatpush3.bf16.msra.mxu1 %v2489_v39 }
 0xbed   : > { %2491 = vmatprep.subr.bf16.mxu1 %v2677_v11 }
 0xc50   : > { %v1508_v63 = vpop.f32.mrb[8].mxu0 }
 0xc51   : > { %v2361_v2 = vpop.f32.mrb[9].mxu0 }
 0xc52   : > { %v1959_v2 = vld [vmem:[%s3309_s10 + $0x48] sm:$0xff] }
 0xcb5   : > { %v1584_v13 = vpop.f32.mrb[10].mxu1 }
 0xcb6   : > { %1741 = vrot.lane.b32.xlu0 %v1584_v13, %s2686_s25  ;;  %v2366_v14 = vpop.f32.mrb[11].mxu1  ;;  %v2513_v13 = vpack.c.bf16 %v1963_v12, %v1962_v23  ;;  %s2080_s25 = sshll.u32 %s3316_s13, 4  ;;  %s2689_s13 = smov [#allocation3]   ;;  %s3254_s25 = int_to_ptr.vmem [resolvable:$true] %s2080_s25 }
 0xcb7   : > { %v1964_v14 = vld [vmem:[%s3309_s10 + $0x70] sm:$0xff]  ;;  %s2613_s21 = scalar_lea.vmem %s3254_s25, 128  ;;  %s2617_s0 = sshll.u32 %s2689_s13, 4  ;;  %s2618_s0 = int_to_ptr.vmem [resolvable:$false] %s2617_s0 }
 0xcb8   : > { %p2614_p12 = scmp.ne.s32.totalorder %s3254_s25, %s2613_s21  ;;  %s2619_s29 = scalar_lea.vmem %s2618_s0, 256 }
 0xcb9   : > { %v1660_v15 = vpop.f32.mrb[10].mxu0  ;;  %p2620_p1 = scmp.lt.s32.totalorder %s3254_s25, %s2618_s0  ;;  %p2621_p2 = scmp.lt.s32.totalorder %s2619_s29, %s2613_s21 }
 0xcba   : > { %1745 = vrot.lane.b32.xlu1 %v1660_v15, %s2687_s14  ;;  %v2371_v8 = vpop.f32.mrb[11].mxu0  ;;  %v1965_v15 = vld [vmem:[%s3309_s10 + $0x78] sm:$0xff]  ;;  %p2615_p13 = pnand %p2614_p12, %p2788_p5 }
 0xcbb   : > { %v2516_v8 = vpack.c.bf16 %v1965_v15, %v1964_v14  ;;  %p2622_p3 = por %p2621_p2, %p2620_p1 }
 0xcbc   : > { %p2616_p0 = pneg %p2615_p13 }
 0xcbd   : > { %v1736_v18 = vpop.f32.mrb[12].mxu1 }
 0xcbe   : > { %1749 = vrot.lane.b32.xlu0 %v1736_v18, %s2688_s16  ;;  %v2376_v19 = vpop.f32.mrb[13].mxu1  ;;  %v1869_v18 = vrot.slane %v2828_v10, %v2928_v57  ;;  %p2623_p4 = pnand %p2622_p3, %p2616_p0 }
 0xd28   : > { %v1742_v20 = vpop.permute.xlu0 %1741 }
 0xd29   : > { %v1752_v22 = vsel %vm1075_vm8, %v1508_v63, %v1742_v20  ;;  %v1958_v63 = vld [vmem:[%s3309_s10 + $0x40] sm:$0xff] }
 0xd2a   : > { %v2507_v3 = vpack.c.bf16 %v1959_v2, %v1958_v63 }
 0xd2c   : > { %v1746_v25 = vpop.permute.xlu1 %1745 }
 0xd2d   : > { %v1754_v27 = vsel %vm1753_vm9, %v1752_v22, %v1746_v25 }
 0xd30   : > { %v1750_v28 = vpop.permute.xlu0 %1749 }
 0xd31   : > { %v1756_v1 = vsel %vm1755_vm10, %v1754_v27, %v1750_v28 }
 0xd32   : > { %2386 = vmatmul.mubr.msk.f32.vlgmr.msra.gmra.mrb[12].mxu0 %vm402_vm0, %v1756_v1 }
 0xd33   : > { %2431 = vmatprep.mubr.msk.f32.mxu0 %vm2678_vm1, %v2679_v17  ;;  %2496 = vmatpush3.bf16.msra.mxu0 %v2495_v51 }
 0xd34   : > { %2497 = vmatprep.subr.bf16.mxu0 %v2677_v11 }
 0xd37   : > { %2499 = vmatpush3.bf16.msra.mxu0 %v2498_v44 }
 0xd38   : > { %2500 = vmatprep.subr.bf16.mxu0 %v2677_v11 }
 0xd3b   : > { %2502 = vmatpush3.bf16.msra.mxu0 %v2501_v58 }
 0xd3c   : > { %2503 = vmatprep.subr.bf16.mxu0 %v2677_v11 }
 0xd3f   : > { %2505 = vmatpush3.bf16.msra.mxu0 %v2504_v61 }
 0xd40   : > { %2506 = vmatprep.subr.bf16.mxu0 %v2677_v11 }
 0xd43   : > { %2508 = vmatpush3.bf16.msra.mxu0 %v2507_v3 }
 0xd44   : > { %2509 = vmatprep.subr.bf16.mxu0 %v2677_v11 }
 0xd47   : > { %2511 = vmatpush3.bf16.msra.mxu0 %v2510_v7 }
 0xd48   : > { %2512 = vmatprep.subr.bf16.mxu0 %v2677_v11 }
 0xd4b   : > { %2514 = vmatpush3.bf16.msra.mxu0 %v2513_v13 }
 0xd4c   : > { %2515 = vmatprep.subr.bf16.mxu0 %v2677_v11 }
 0xd4f   : > { %2517 = vmatpush3.bf16.msra.mxu0 %v2516_v8 }
 0xe05   : > { %v1834_v30 = vpop.f32.mrb[12].mxu0 }
 0xe06   : > { %v1835_v16 = vadd.f32 %v1834_v30, %v1764_v29  ;;  %v2387_v31 = vpop.f32.mrb[13].mxu0  ;;  %v1969_v30 = vrot.slane %v2828_v10, %v2935_v6 }
 0xe08   : > { %v3156_v32 = vadd.f32 %v1835_v16, %v3035_v21  ;;  %v1864_v21 = vld [vmem:[%s3308_s9 + $0x10] sm:$0xff] }
 0xe09   : > { %v2492_v41 = vpack.c.bf16 %v1865_v40, %v1864_v21 }
 0xe0a   : > { %v1839_v0 = vsel %vm402_vm0, %v3156_v32, 0.0 }
 0xe0b   : > { %1840 = vadd.xlane.f32.xlu1 %v1839_v0  ;;  %2493 = vmatpush3.bf16.msra.mxu1 %v2492_v41 }
 0xe98   : > { %v1841_v33 = vpop.xlane.xlu1 %1840 }
 0xe99   : > { %v1842_v34 = vmul.f32 0.03125, %v1841_v33 }
 0xe9b   : > { %v1843_v35 = vsub.f32 %v3156_v32, %v1842_v34 }
 0xe9d   : > { %v1844_v38 = vmul.f32 %v1843_v35, %v1843_v35 }
 0xe9f   : > { %v1845_v17 = vsel %vm402_vm0, %v1844_v38, 0.0 }
 0xea0   : > { %1846 = vadd.xlane.f32.xlu0 %v1845_v17 }
 0xf2d   : > { %v1847_v42 = vpop.xlane.xlu0 %1846 }
 0xf2e   : > { %v1848_v43 = vmul.f32 0.03125, %v1847_v42  ;;  %v2063_v42 = vrot.slane %v2828_v10, %v2963_v37 }
 0xf30   : > { %v1849_v45 = vadd.f32 1e-05, %v1848_v43 }
 0xf32   : > { %2605 = vrsqrt.f32 %v1849_v45 }
 0xf3c   : > { %v2606_v47 = vpop.eup %2605 }
 0xf3d   : > { %v1851_v48 = vmul.f32 %v2606_v47, %v1843_v35 }
 0xf3f   : > { %v1856_v50 = vmul.f32 %v1855_v46, %v1851_v48 }
 0xf41   : > { %v1861_v53 = vadd.f32 %v1860_v49, %v1856_v50 }
 0xf43   : > { %2397 = vmatmul.mubr.msk.f32.vlgmr.msra.gmra.mrb[14].mxu1 %vm402_vm0, %v1861_v53 }
0x1016   : > { %v1939_v19 = vpop.f32.mrb[14].mxu1 }
0x1017   : > { %v1940_v20 = vadd.f32 %v1939_v19, %v1869_v18  ;;  %v2398_v25 = vpop.f32.mrb[15].mxu1 }
0x1019   : > { %v1943_v22 = vsub.f32 0.0, %v1940_v20 }
0x101b   : > { %v1944_v27 = vmul.f32 1.442695, %v1943_v22 }
0x101d   : > { %2607 = vpow2.f32 %v1944_v27 }
0x1027   : > { %v2608_v11 = vpop.eup %2607 }
0x1028   : > { %v1946_v28 = vadd.f32 1.0, %v2608_v11 }
0x102a   : > { %2609 = vrcp.f32 %v1946_v28 }
0x1034   : > { %v2610_v1 = vpop.eup %2609 }
0x1035   : > { %v1949_v29 = vmul.f32 %v2610_v1, %v1940_v20 }
0x1037   : > { %2432 = vmatmul.mubr.f32.vlgmr.msra.gmra.mrb[14].mxu0 %v1949_v29 }
0x110a   : > { %v2036_v16 = vpop.f32.mrb[14].mxu0 }
0x110b   : > { %v2037_v31 = vadd.f32 %v2036_v16, %v1969_v30  ;;  %v2433_v0 = vpop.f32.mrb[15].mxu0 }
0x110d   : > { %v2040_v33 = vmul.f32 0.5, %v2037_v31 }
0x110f   : > { %v2041_v57 = vadd.f32 %v2040_v33, %v3156_v32  ;;  %v2058_v32 = vrot.slane %v2828_v10, %v2960_v36 }
0x1111   : > { %v2042_v34 = vsel %vm402_vm0, %v2041_v57, 0.0 }
0x1112   : > { %2043 = vadd.xlane.f32.xlu0 %v2042_v34 }
0x119f   : > { %v2044_v35 = vpop.xlane.xlu0 %2043 }
0x11a0   : > { %v2045_v38 = vmul.f32 0.03125, %v2044_v35 }
0x11a2   : > { %v2046_v17 = vsub.f32 %v2041_v57, %v2045_v38 }
0x11a4   : > { %v2047_v9 = vmul.f32 %v2046_v17, %v2046_v17 }
0x11a6   : > { %v2048_v62 = vsel %vm402_vm0, %v2047_v9, 0.0 }
0x11a7   : > { %2049 = vadd.xlane.f32.xlu1 %v2048_v62 }
0x1234   : > { %v2050_v6 = vpop.xlane.xlu1 %2049 }
0x1235   : > { %v2051_v21 = vmul.f32 0.03125, %v2050_v6 }
0x1237   : > { %v2052_v39 = vadd.f32 1e-05, %v2051_v21 }
0x1239   : > { %2611 = vrsqrt.f32 %v2052_v39 }
0x1243   : > { %v2612_v40 = vpop.eup %2611 }
0x1244   : > { %v2054_v41 = vmul.f32 %v2612_v40, %v2046_v17 }
0x1246   : > { %v2059_v43 = vmul.f32 %v2058_v32, %v2054_v41 }
0x1248   : > { %v2064_v45 = vadd.f32 %v2063_v42, %v2059_v43 }
0x124a   : > { %2065 = vst.msk [vmem:[%s3317_s30] sm:$0xff] %vm402_vm0, %v2064_v45 }
0x124b   : > { %2626 = shalt.err (!%p2623_p4)
}
0x124c   : > { %s2627_s15 = scalar_lea.hbm %s3252_s22, 128  ;;  %s2631_s30 = scalar_lea.hbm %s3310_s11, 256 }
0x124d   : > { %p2628_p7 = scmp.ne.s32.totalorder %s3252_s22, %s2627_s15  ;;  %p2632_p10 = scmp.lt.u32.totalorder %s3252_s22, %s3310_s11 }
0x124e   : > { %p2633_p11 = scmp.lt.u32.totalorder %s2631_s30, %s2627_s15  ;;  %p2635_p13 = scmp.lt.u32.totalorder %s2627_s15, %s3252_s22 }
0x124f   : > { %p2629_p8 = pnand %p2628_p7, %p2788_p5 }
0x1250   : > { %p2634_p12 = por %p2633_p11, %p2632_p10 }
0x1251   : > { %p2630_p9 = pneg %p2629_p8 }
0x1252   : > { %p2636_p0 = por %p2635_p13, %p2634_p12 }
0x1254   : > { %p2637_p1 = pnand %p2636_p0, %p2630_p9 }
0x1256   : > { %2640 = shalt.err (!%p2637_p1)
}
0x1257   : > { %2518 = dma.vmem_to_hbm [thread:$0]  (%p2788_p5), %s3254_s25, 128, %s3252_s22, %s2067_s24  }
0x1258 PF: > { %p2524_p2 = scmp.ge.s32.totalorder %s2675_s20, 2  ;;  %s2092_s21 = sand.u32 1, %s2663_s17  }
0x1259   : > { %s2093_s13 = scalar_lea.sflag [#allocation4], %s2092_s21 }
0x125a   : > { %p2521_p3 = pnand %p2524_p2, %p2792_p6 }
0x125c   : > { %2658 = dma.done.wait (!%p2521_p3), %s2093_s13, 128  }
0x125d   : > { %2660 = vsyncadd (!%p2521_p3), %s2093_s13, 4294967168  ;;  %p21_p4 = scmp.ge.s32.totalorder %s2775_s23, 4   ;;  %s3319_s17 = smov %s2667_s18 }
0x125e   : > { %s3320_s18 = smov %s2671_s19  ;;  %s3321_s19 = smov %s2786_s26 }
0x125f   : > { %s3322_s20 = smov %s2775_s23  ;;  %23 = sbr.rel (!%p21_p4) target bundleno = 5 (0x5), region = 106 }
0x1266   :  { %2098 = vsyncpa [#allocation4], 1 }
0x1267   :  { %2100 = vsyncpa [#allocation4 + $0x1], 1 }

</bundles_post_ra>
